<compile_context>
chip_gen: v7x
topology: tpu7x:2x2x1
jax: 0.10.0
libtpu: 0.0.40
codegen_flags: <defaults>
</compile_context>

<pallas_src>
import functools
import math

import jax
import jax.numpy as jnp
from jax import lax
from jax.experimental import pallas as pl
from jax.experimental.pallas import tpu as pltpu


# ----------------------------------------------------------------------------
# small helpers
# ----------------------------------------------------------------------------
def _round_up(n, m):
    return ((n + m - 1) // m) * m


def _pick_h_tile(h, target):
    """Largest tile <= target that is a multiple of 8 and divides h (or h itself)."""
    if h <= target:
        return h
    t = (min(target, h) // 8) * 8
    while t >= 8:
        if h % t == 0:
            return t
        t -= 8
    return h


# ----------------------------------------------------------------------------
# Pallas kernel: same-padding KxK conv as matmul-over-taps on a flattened image
# ----------------------------------------------------------------------------
def _conv_flat_kernel(n_groups, tap_offsets, max_off, relu, *refs):
    """refs = (w_0..w_{G-1}, bias, x_0..x_{G-1}, out).

    w_g  : (K*K, Cout, Cin_g)   resident (index_map constant -> single DMA)
    bias : (Cout, 1)
    x_g  : (1, Cin_g, Len)      whole padded+flattened image, revisited across tiles
    out  : (1, Cout, T)         lane-dense output tile (T % 128 == 0)
    """
    w_refs = refs[:n_groups]
    b_ref = refs[n_groups]
    x_refs = refs[n_groups + 1:2 * n_groups + 1]
    o_ref = refs[2 * n_groups + 1]

    cout, t_hw = o_ref.shape[1], o_ref.shape[2]
    j0 = pl.multiple_of(pl.program_id(1) * t_hw, 128)

    # bias folded into the accumulator init (no separate (Cout,1) add per step)
    acc = jnp.broadcast_to(b_ref[...], (cout, t_hw)).astype(jnp.float32)

    for g in range(n_groups):
        # one 128-aligned load of the tile + halo slab; taps are static lane slices of it
        slab = x_refs[g][0, :, pl.ds(j0, t_hw + max_off)]
        for t, off in enumerate(tap_offsets):
            xt = slab[:, off:off + t_hw]
            acc = acc + jnp.dot(w_refs[g][t], xt,
                                preferred_element_type=jnp.float32)

    if relu:
        acc = jnp.maximum(acc, 0.0)
    o_ref[0] = acc.astype(o_ref.dtype)


def conv2d_pallas(xs, weights, bias, *, relu, tile_hw=2048):
    """Same-padding KxK convolution (NCHW) without materialized im2col.

    xs      : list of inputs (B, Cin_g, H, W) sharing B/H/W (channel groups of one conv).
    weights : list of (Cout, Cin_g, K, K) matching xs.
    bias    : (Cout,)
    """
    assert len(xs) == len(weights) and len(xs) >= 1
    B, _, H, W = xs[0].shape
    Cout, _, K, _ = weights[0].shape
    p = K // 2
    Wp, Hp = W + 2 * p, H + 2 * p

    n_out = H * Wp                                   # flat output length (cols < W kept later)
    t_hw = min(tile_hw, _round_up(n_out, 128))       # lane-dense tile, multiple of 128
    n_tiles = pl.cdiv(n_out, t_hw)
    max_off = (K - 1) * Wp + (K - 1)                 # largest tap offset (halo)
    length = n_tiles * t_hw + max_off                # padded flat length -> no OOB slab reads
    tap_offsets = tuple(kh * Wp + kw for kh in range(K) for kw in range(K))

    x_flats, w_flats, in_specs = [], [], []
    for x, w in zip(xs, weights):
        cin = x.shape[1]
        xp = jnp.pad(x, ((0, 0), (0, 0), (p, p), (p, p))).reshape(B, cin, Hp * Wp)
        xp = jnp.pad(xp, ((0, 0), (0, 0), (0, length - Hp * Wp)))
        x_flats.append(xp)
        # tap-major weights: (K*K, Cout, Cin_g), tap index = kh*K + kw
        w_flats.append(jnp.transpose(w, (2, 3, 0, 1)).reshape(K * K, Cout, cin))

    for w in w_flats:
        in_specs.append(pl.BlockSpec(w.shape, lambda b, t: (0, 0, 0)))
    in_specs.append(pl.BlockSpec((Cout, 1), lambda b, t: (0, 0)))
    for x in x_flats:
        in_specs.append(pl.BlockSpec((1, x.shape[1], length), lambda b, t: (b, 0, 0)))

    out = pl.pallas_call(
        functools.partial(_conv_flat_kernel, len(xs), tap_offsets, max_off, relu),
        out_shape=jax.ShapeDtypeStruct((B, Cout, n_tiles * t_hw), xs[0].dtype),
        grid=(B, n_tiles),
        in_specs=in_specs,
        out_specs=pl.BlockSpec((1, Cout, t_hw), lambda b, t: (b, 0, t)),
        compiler_params=pltpu.CompilerParams(
            dimension_semantics=("parallel", "parallel")),
    )(*w_flats, bias.reshape(Cout, 1), *x_flats)

    # unflatten: keep columns w' < W of each Wp-wide row
    return out[:, :, :n_out].reshape(B, Cout, H, Wp)[:, :, :, :W]


# ----------------------------------------------------------------------------
# Pallas kernel: divide by root-sum-of-squares over coil+complex (lane-dense)
# ----------------------------------------------------------------------------
def _rss_divide_kernel(eps, x_ref, o_ref):
    """x_ref/o_ref: (1, coils*2, TH, W). Divide by RSS over axis 1 (non-lane reduction)."""
    v = x_ref[...]
    ss = jnp.sum(v * v, axis=1, keepdims=True)       # VPU adds, no cross-lane reduce
    o_ref[...] = (v * lax.rsqrt(ss + eps)).astype(o_ref.dtype)


def divide_root_sum_of_squares_pallas(x, *, eps=1e-12, tile_h=128):
    """x: (b, c, h, w, 2) -> x / sqrt(sum_{c,complex} x^2) (broadcast over c and complex)."""
    b, c, h, w, two = x.shape
    assert two == 2
    # lane-dense layout: W stays in lanes; coil*complex becomes a leading (non-lane) axis
    xt = jnp.transpose(x, (0, 1, 4, 2, 3)).reshape(b, 2 * c, h, w)
    th = _pick_h_tile(h, tile_h)
    out = pl.pallas_call(
        functools.partial(_rss_divide_kernel, eps),
        out_shape=jax.ShapeDtypeStruct((b, 2 * c, h, w), x.dtype),
        grid=(b, h // th),
        in_specs=[pl.BlockSpec((1, 2 * c, th, w), lambda i, j: (i, 0, j, 0))],
        out_specs=pl.BlockSpec((1, 2 * c, th, w), lambda i, j: (i, 0, j, 0)),
        compiler_params=pltpu.CompilerParams(
            dimension_semantics=("parallel", "parallel")),
    )(xt)
    return jnp.transpose(out.reshape(b, c, 2, h, w), (0, 1, 3, 4, 2))


# ----------------------------------------------------------------------------
# Plain-JAX glue reproducing the PyTorch helper semantics
# ----------------------------------------------------------------------------
def ifft2c(data):
    """Centered 2-D inverse FFT on (..., h, w, 2) real-pair tensors (norm='ortho')."""
    # TODO(synk): FFT has no Pallas primitive; computed with jnp.fft (XLA) in plain JAX.
    xc = data[..., 0] + 1j * data[..., 1]
    xc = jnp.fft.ifftshift(xc, axes=(-2, -1))
    xc = jnp.fft.ifftn(xc, axes=(-2, -1), norm="ortho")
    xc = jnp.fft.fftshift(xc, axes=(-2, -1))
    return jnp.stack([xc.real, xc.imag], axis=-1).astype(data.dtype)


def get_pad_and_num_low_freqs(mask, num_low_frequencies=None):
    if num_low_frequencies is None or num_low_frequencies == 0:
        squeezed_mask = mask[:, 0, 0, :, 0].astype(jnp.int8)
        cent = squeezed_mask.shape[1] // 2
        left = jnp.argmin(jnp.flip(squeezed_mask[:, :cent], axis=1), axis=1)
        right = jnp.argmin(squeezed_mask[:, cent:], axis=1)
        nlf = jnp.maximum(2 * jnp.minimum(left, right), jnp.ones_like(left))
    else:
        nlf = num_low_frequencies * jnp.ones((mask.shape[0],), dtype=jnp.int32)
    pad = (mask.shape[-2] - nlf + 1) // 2
    return pad.astype(jnp.int32), nlf.astype(jnp.int32)


def batched_mask_center(x, mask_from, mask_to):
    """x: (b, c, h, w, 2); keep only columns [mask_from, mask_to) per batch element."""
    w = x.shape[3]
    cols = jnp.arange(w, dtype=jnp.int32)
    keep = (cols[None, :] >= mask_from[:, None]) & (cols[None, :] < mask_to[:, None])
    return x * keep[:, None, None, :, None].astype(x.dtype)


# ----------------------------------------------------------------------------
# U-Net stand-in + NormUnet + SensitivityModel forward
# ----------------------------------------------------------------------------
def _avg_pool2(x):
    B, C, H, W = x.shape
    return x.reshape(B, C, H // 2, 2, W // 2, 2).mean(axis=(3, 5))


def _upsample2(x):
    return jnp.repeat(jnp.repeat(x, 2, axis=2), 2, axis=3)


def init_unet_params(key, in_ch=2, out_ch=2, chans=8):
    def conv_init(k, cout, cin, ksz):
        k1, k2 = jax.random.split(k)
        fan_in = cin * ksz * ksz
        w = jax.random.normal(k1, (cout, cin, ksz, ksz), jnp.float32) / math.sqrt(fan_in)
        b = 0.01 * jax.random.normal(k2, (cout,), jnp.float32)
        return w, b

    keys = jax.random.split(key, 4)
    return {
        "enc": conv_init(keys[0], chans, in_ch, 3),
        "bott": conv_init(keys[1], 2 * chans, chans, 3),
        "dec": conv_init(keys[2], chans, 3 * chans, 3),
        "final": conv_init(keys[3], out_ch, chans, 1),
    }


def unet_forward(params, x):
    e = conv2d_pallas([x], [params["enc"][0]], params["enc"][1], relu=True)
    pooled = _avg_pool2(e)
    m = conv2d_pallas([pooled], [params["bott"][0]], params["bott"][1], relu=True)
    u = _upsample2(m)
    wd, bd = params["dec"]
    cu = u.shape[1]
    # dec conv over concat([u, e]) as two accumulated weight groups -> no HBM concat
    d = conv2d_pallas([u, e], [wd[:, :cu], wd[:, cu:]], bd, relu=True)
    return conv2d_pallas([d], [params["final"][0]], params["final"][1], relu=False)


def norm_unet_forward(params, x):
    """x: (B, c, h, w, 2) -> (B, c, h, w, 2)  (here c == 1 per coil-as-batch)."""
    b, c, h, w, two = x.shape
    assert two == 2
    # complex_to_chan_dim
    x = jnp.transpose(x, (0, 4, 1, 2, 3)).reshape(b, 2 * c, h, w)
    B, C, H, W = x.shape
    # norm (group-wise over the 2 complex groups; torch.std is unbiased -> ddof=1)
    xg = x.reshape(B, 2, -1)
    mean = xg.mean(axis=2).reshape(B, 2, 1, 1)
    std = jnp.std(xg, axis=2, ddof=1).reshape(B, 2, 1, 1)
    x = (x - mean) / std
    # pad spatial dims to multiples of 16 (static shape arithmetic)
    w_mult = ((W - 1) | 15) + 1
    h_mult = ((H - 1) | 15) + 1
    w_pad = [(w_mult - W) // 2, (w_mult - W + 1) // 2]
    h_pad = [(h_mult - H) // 2, (h_mult - H + 1) // 2]
    x = jnp.pad(x, ((0, 0), (0, 0), (h_pad[0], h_pad[1]), (w_pad[0], w_pad[1])))
    x = unet_forward(params, x)
    x = x[..., h_pad[0]:h_mult - h_pad[1], w_pad[0]:w_mult - w_pad[1]]
    # unnorm
    x = x * std + mean
    # chan_complex_to_last_dim
    x = x.reshape(B, 2, C // 2, H, W)
    return jnp.transpose(x, (0, 2, 3, 4, 1))


def sensitivity_model_forward(params, masked_kspace, mask,
                              num_low_frequencies=None, mask_center=True):
    """masked_kspace: (b, coils, h, w, 2);  mask: (b, 1, 1, w, 1)."""
    if mask_center:
        pad, nlf = get_pad_and_num_low_freqs(mask, num_low_frequencies)
        masked_kspace = batched_mask_center(masked_kspace, pad, pad + nlf)
    images = ifft2c(masked_kspace)                       # (b, c, h, w, 2)
    b, c, h, w, _ = images.shape
    images = images.reshape(b * c, 1, h, w, 2)           # chans_to_batch_dim
    out = norm_unet_forward(params, images)              # (b*c, 1, h, w, 2)
    out = out.reshape(b, c, h, w, 2)                     # batch_chans_to_chan_dim
    return divide_root_sum_of_squares_pallas(out)


# ----------------------------------------------------------------------------
if __name__ == "__main__":
    key = jax.random.PRNGKey(0)
    k_params, k_kspace = jax.random.split(key)

    b, coils, H, W = 2, 4, 16, 16
    chans = 8
    params = init_unet_params(k_params, in_ch=2, out_ch=2, chans=chans)

    kspace = jax.random.normal(k_kspace, (b, coils, H, W, 2), jnp.float32)
    # sampling mask: fully-sampled centre columns 6..9 plus a few outer columns
    col_mask = jnp.zeros((W,), jnp.float32).at[
        jnp.array([0, 3, 6, 7, 8, 9, 12, 15])].set(1.0)
    mask = jnp.broadcast_to(col_mask[None, None, None, :, None], (b, 1, 1, W, 1))
    masked_kspace = kspace * mask

    fwd = jax.jit(lambda ks, m: sensitivity_model_forward(params, ks, m, None, True))
    out = jax.block_until_ready(fwd(masked_kspace, mask))

    assert out.shape == (b, coils, H, W, 2), out.shape
    assert jnp.all(jnp.isfinite(out))
    print("KERNEL_OK")
</pallas_src>

<mosaic_0001>
module attributes {stable_mosaic.version = 11 : i64} {
  func.func @_conv_flat_kernel(%arg0: i32, %arg1: i32, %arg2: memref<9x8x2xf32, #tpu.memory_space<vmem>>, %arg3: memref<8x1xf32, #tpu.memory_space<vmem>>, %arg4: memref<1x2x422xf32, #tpu.memory_space<vmem>>, %arg5: memref<1x8x384xf32, #tpu.memory_space<vmem>>) attributes {dimension_semantics = [#tpu.dimension_semantics<parallel>, #tpu.dimension_semantics<parallel>], iteration_bounds = array<i64: 8, 1>, scalar_prefetch = 0 : i64, scratch_operands = 0 : i64, tpu.core_type = #tpu.core_type<tc>, window_params = [{pipeline_mode = #tpu.pipeline_mode<synchronous>, transform_indices = @transform_0, window_bounds = array<i64: 9, 8, 2>}, {pipeline_mode = #tpu.pipeline_mode<synchronous>, transform_indices = @transform_1, window_bounds = array<i64: 8, 1>}, {transform_indices = @transform_2, window_bounds = array<i64: 1, 2, 422>}, {transform_indices = @transform_3, window_bounds = array<i64: 1, 8, 384>}]} {
    %c384_i32 = arith.constant 384 : i32
    %0 = arith.muli %arg1, %c384_i32 : i32
    %1 = tpu.assume_multiple %0, 128 : i32
    %c0 = arith.constant 0 : index
    %c0_0 = arith.constant 0 : index
    %2 = vector.load %arg3[%c0, %c0_0] : memref<8x1xf32, #tpu.memory_space<vmem>>, vector<8x1xf32>
    %3 = vector.shape_cast %2 : vector<8x1xf32> to vector<8x1xf32>
    %4 = vector.broadcast %3 : vector<8x1xf32> to vector<8x384xf32>
    %c0_1 = arith.constant 0 : index
    %c0_2 = arith.constant 0 : index
    %5 = arith.index_cast %1 : i32 to index
    %6 = vector.load %arg4[%c0_1, %c0_2, %5] : memref<1x2x422xf32, #tpu.memory_space<vmem>>, vector<1x2x422xf32>
    %7 = vector.shape_cast %6 : vector<1x2x422xf32> to vector<2x422xf32>
    %8 = vector.extract_strided_slice %7 {offsets = [0, 0], sizes = [2, 384], strides = [1, 1]} : vector<2x422xf32> to vector<2x384xf32>
    %c0_3 = arith.constant 0 : index
    %c0_4 = arith.constant 0 : index
    %c0_5 = arith.constant 0 : index
    %9 = vector.load %arg2[%c0_3, %c0_4, %c0_5] : memref<9x8x2xf32, #tpu.memory_space<vmem>>, vector<1x8x2xf32>
    %10 = vector.shape_cast %9 : vector<1x8x2xf32> to vector<8x2xf32>
    %cst = arith.constant dense<0.000000e+00> : vector<8x384xf32>
    %11 = tpu.matmul %10, %8, %cst {dimension_numbers = #tpu.dot_dimension_numbers<[1], [0], [0], [1], [0, 0, 1, 1], [], []>} : vector<8x2xf32>, vector<2x384xf32>, vector<8x384xf32> -> vector<8x384xf32>
    %12 = arith.addf %4, %11 : vector<8x384xf32>
    %13 = vector.extract_strided_slice %7 {offsets = [0, 1], sizes = [2, 384], strides = [1, 1]} : vector<2x422xf32> to vector<2x384xf32>
    %c1 = arith.constant 1 : index
    %c0_6 = arith.constant 0 : index
    %c0_7 = arith.constant 0 : index
    %14 = vector.load %arg2[%c1, %c0_6, %c0_7] : memref<9x8x2xf32, #tpu.memory_space<vmem>>, vector<1x8x2xf32>
    %15 = vector.shape_cast %14 : vector<1x8x2xf32> to vector<8x2xf32>
    %cst_8 = arith.constant dense<0.000000e+00> : vector<8x384xf32>
    %16 = tpu.matmul %15, %13, %cst_8 {dimension_numbers = #tpu.dot_dimension_numbers<[1], [0], [0], [1], [0, 0, 1, 1], [], []>} : vector<8x2xf32>, vector<2x384xf32>, vector<8x384xf32> -> vector<8x384xf32>
    %17 = arith.addf %12, %16 : vector<8x384xf32>
    %18 = vector.extract_strided_slice %7 {offsets = [0, 2], sizes = [2, 384], strides = [1, 1]} : vector<2x422xf32> to vector<2x384xf32>
    %c2 = arith.constant 2 : index
    %c0_9 = arith.constant 0 : index
    %c0_10 = arith.constant 0 : index
    %19 = vector.load %arg2[%c2, %c0_9, %c0_10] : memref<9x8x2xf32, #tpu.memory_space<vmem>>, vector<1x8x2xf32>
    %20 = vector.shape_cast %19 : vector<1x8x2xf32> to vector<8x2xf32>
    %cst_11 = arith.constant dense<0.000000e+00> : vector<8x384xf32>
    %21 = tpu.matmul %20, %18, %cst_11 {dimension_numbers = #tpu.dot_dimension_numbers<[1], [0], [0], [1], [0, 0, 1, 1], [], []>} : vector<8x2xf32>, vector<2x384xf32>, vector<8x384xf32> -> vector<8x384xf32>
    %22 = arith.addf %17, %21 : vector<8x384xf32>
    %23 = vector.extract_strided_slice %7 {offsets = [0, 18], sizes = [2, 384], strides = [1, 1]} : vector<2x422xf32> to vector<2x384xf32>
    %c3 = arith.constant 3 : index
    %c0_12 = arith.constant 0 : index
    %c0_13 = arith.constant 0 : index
    %24 = vector.load %arg2[%c3, %c0_12, %c0_13] : memref<9x8x2xf32, #tpu.memory_space<vmem>>, vector<1x8x2xf32>
    %25 = vector.shape_cast %24 : vector<1x8x2xf32> to vector<8x2xf32>
    %cst_14 = arith.constant dense<0.000000e+00> : vector<8x384xf32>
    %26 = tpu.matmul %25, %23, %cst_14 {dimension_numbers = #tpu.dot_dimension_numbers<[1], [0], [0], [1], [0, 0, 1, 1], [], []>} : vector<8x2xf32>, vector<2x384xf32>, vector<8x384xf32> -> vector<8x384xf32>
    %27 = arith.addf %22, %26 : vector<8x384xf32>
    %28 = vector.extract_strided_slice %7 {offsets = [0, 19], sizes = [2, 384], strides = [1, 1]} : vector<2x422xf32> to vector<2x384xf32>
    %c4 = arith.constant 4 : index
    %c0_15 = arith.constant 0 : index
    %c0_16 = arith.constant 0 : index
    %29 = vector.load %arg2[%c4, %c0_15, %c0_16] : memref<9x8x2xf32, #tpu.memory_space<vmem>>, vector<1x8x2xf32>
    %30 = vector.shape_cast %29 : vector<1x8x2xf32> to vector<8x2xf32>
    %cst_17 = arith.constant dense<0.000000e+00> : vector<8x384xf32>
    %31 = tpu.matmul %30, %28, %cst_17 {dimension_numbers = #tpu.dot_dimension_numbers<[1], [0], [0], [1], [0, 0, 1, 1], [], []>} : vector<8x2xf32>, vector<2x384xf32>, vector<8x384xf32> -> vector<8x384xf32>
    %32 = arith.addf %27, %31 : vector<8x384xf32>
    %33 = vector.extract_strided_slice %7 {offsets = [0, 20], sizes = [2, 384], strides = [1, 1]} : vector<2x422xf32> to vector<2x384xf32>
    %c5 = arith.constant 5 : index
    %c0_18 = arith.constant 0 : index
    %c0_19 = arith.constant 0 : index
    %34 = vector.load %arg2[%c5, %c0_18, %c0_19] : memref<9x8x2xf32, #tpu.memory_space<vmem>>, vector<1x8x2xf32>
    %35 = vector.shape_cast %34 : vector<1x8x2xf32> to vector<8x2xf32>
    %cst_20 = arith.constant dense<0.000000e+00> : vector<8x384xf32>
    %36 = tpu.matmul %35, %33, %cst_20 {dimension_numbers = #tpu.dot_dimension_numbers<[1], [0], [0], [1], [0, 0, 1, 1], [], []>} : vector<8x2xf32>, vector<2x384xf32>, vector<8x384xf32> -> vector<8x384xf32>
    %37 = arith.addf %32, %36 : vector<8x384xf32>
    %38 = vector.extract_strided_slice %7 {offsets = [0, 36], sizes = [2, 384], strides = [1, 1]} : vector<2x422xf32> to vector<2x384xf32>
    %c6 = arith.constant 6 : index
    %c0_21 = arith.constant 0 : index
    %c0_22 = arith.constant 0 : index
    %39 = vector.load %arg2[%c6, %c0_21, %c0_22] : memref<9x8x2xf32, #tpu.memory_space<vmem>>, vector<1x8x2xf32>
    %40 = vector.shape_cast %39 : vector<1x8x2xf32> to vector<8x2xf32>
    %cst_23 = arith.constant dense<0.000000e+00> : vector<8x384xf32>
    %41 = tpu.matmul %40, %38, %cst_23 {dimension_numbers = #tpu.dot_dimension_numbers<[1], [0], [0], [1], [0, 0, 1, 1], [], []>} : vector<8x2xf32>, vector<2x384xf32>, vector<8x384xf32> -> vector<8x384xf32>
    %42 = arith.addf %37, %41 : vector<8x384xf32>
    %43 = vector.extract_strided_slice %7 {offsets = [0, 37], sizes = [2, 384], strides = [1, 1]} : vector<2x422xf32> to vector<2x384xf32>
    %c7 = arith.constant 7 : index
    %c0_24 = arith.constant 0 : index
    %c0_25 = arith.constant 0 : index
    %44 = vector.load %arg2[%c7, %c0_24, %c0_25] : memref<9x8x2xf32, #tpu.memory_space<vmem>>, vector<1x8x2xf32>
    %45 = vector.shape_cast %44 : vector<1x8x2xf32> to vector<8x2xf32>
    %cst_26 = arith.constant dense<0.000000e+00> : vector<8x384xf32>
    %46 = tpu.matmul %45, %43, %cst_26 {dimension_numbers = #tpu.dot_dimension_numbers<[1], [0], [0], [1], [0, 0, 1, 1], [], []>} : vector<8x2xf32>, vector<2x384xf32>, vector<8x384xf32> -> vector<8x384xf32>
    %47 = arith.addf %42, %46 : vector<8x384xf32>
    %48 = vector.extract_strided_slice %7 {offsets = [0, 38], sizes = [2, 384], strides = [1, 1]} : vector<2x422xf32> to vector<2x384xf32>
    %c8 = arith.constant 8 : index
    %c0_27 = arith.constant 0 : index
    %c0_28 = arith.constant 0 : index
    %49 = vector.load %arg2[%c8, %c0_27, %c0_28] : memref<9x8x2xf32, #tpu.memory_space<vmem>>, vector<1x8x2xf32>
    %50 = vector.shape_cast %49 : vector<1x8x2xf32> to vector<8x2xf32>
    %cst_29 = arith.constant dense<0.000000e+00> : vector<8x384xf32>
    %51 = tpu.matmul %50, %48, %cst_29 {dimension_numbers = #tpu.dot_dimension_numbers<[1], [0], [0], [1], [0, 0, 1, 1], [], []>} : vector<8x2xf32>, vector<2x384xf32>, vector<8x384xf32> -> vector<8x384xf32>
    %52 = arith.addf %47, %51 : vector<8x384xf32>
    %cst_30 = arith.constant 0.000000e+00 : f32
    %53 = vector.broadcast %cst_30 : f32 to vector<8x384xf32>
    %54 = arith.maximumf %52, %53 : vector<8x384xf32>
    %c0_31 = arith.constant 0 : index
    %c0_32 = arith.constant 0 : index
    %c0_33 = arith.constant 0 : index
    %55 = vector.load %arg5[%c0_31, %c0_32, %c0_33] : memref<1x8x384xf32, #tpu.memory_space<vmem>>, vector<1x8x384xf32>
    %56 = vector.shape_cast %55 : vector<1x8x384xf32> to vector<8x384xf32>
    %57 = vector.shape_cast %54 : vector<8x384xf32> to vector<1x8x384xf32>
    tpu.vector_store %arg5[%c0_31, %c0_32, %c0_33], %57 {strides = array<i32>} : memref<1x8x384xf32, #tpu.memory_space<vmem>>, vector<1x8x384xf32>,
    return
  }
  func.func @transform_0(%arg0: i32, %arg1: i32) -> (i32, i32, i32) {
    %c0_i32 = arith.constant 0 : i32
    %c0_i32_0 = arith.constant 0 : i32
    %c0_i32_1 = arith.constant 0 : i32
    %c0_i32_2 = arith.constant 0 : i32
    return %c0_i32, %c0_i32_0, %c0_i32_1 : i32, i32, i32
  }
  func.func @transform_1(%arg0: i32, %arg1: i32) -> (i32, i32) {
    %c0_i32 = arith.constant 0 : i32
    %c0_i32_0 = arith.constant 0 : i32
    %c0_i32_1 = arith.constant 0 : i32
    return %c0_i32, %c0_i32_0 : i32, i32
  }
  func.func @transform_2(%arg0: i32, %arg1: i32) -> (i32, i32, i32) {
    %c0_i32 = arith.constant 0 : i32
    %c0_i32_0 = arith.constant 0 : i32
    %c0_i32_1 = arith.constant 0 : i32
    return %arg0, %c0_i32, %c0_i32_0 : i32, i32, i32
  }
  func.func @transform_3(%arg0: i32, %arg1: i32) -> (i32, i32, i32) {
    %c0_i32 = arith.constant 0 : i32
    %c0_i32_0 = arith.constant 0 : i32
    return %arg0, %c0_i32, %arg1 : i32, i32, i32
  }
}

module attributes {stable_mosaic.version = 11 : i64} {
  func.func @_conv_flat_kernel(%arg0: i32, %arg1: i32, %arg2: memref<9x16x8xf32, #tpu.memory_space<vmem>>, %arg3: memref<16x1xf32, #tpu.memory_space<vmem>>, %arg4: memref<1x8x150xf32, #tpu.memory_space<vmem>>, %arg5: memref<1x16x128xf32, #tpu.memory_space<vmem>>) attributes {dimension_semantics = [#tpu.dimension_semantics<parallel>, #tpu.dimension_semantics<parallel>], iteration_bounds = array<i64: 8, 1>, scalar_prefetch = 0 : i64, scratch_operands = 0 : i64, tpu.core_type = #tpu.core_type<tc>, window_params = [{pipeline_mode = #tpu.pipeline_mode<synchronous>, transform_indices = @transform_0, window_bounds = array<i64: 9, 16, 8>}, {pipeline_mode = #tpu.pipeline_mode<synchronous>, transform_indices = @transform_1, window_bounds = array<i64: 16, 1>}, {transform_indices = @transform_2, window_bounds = array<i64: 1, 8, 150>}, {transform_indices = @transform_3, window_bounds = array<i64: 1, 16, 128>}]} {
    %c128_i32 = arith.constant 128 : i32
    %0 = arith.muli %arg1, %c128_i32 : i32
    %1 = tpu.assume_multiple %0, 128 : i32
    %c0 = arith.constant 0 : index
    %c0_0 = arith.constant 0 : index
    %2 = vector.load %arg3[%c0, %c0_0] : memref<16x1xf32, #tpu.memory_space<vmem>>, vector<16x1xf32>
    %3 = vector.shape_cast %2 : vector<16x1xf32> to vector<16x1xf32>
    %4 = vector.broadcast %3 : vector<16x1xf32> to vector<16x128xf32>
    %c0_1 = arith.constant 0 : index
    %c0_2 = arith.constant 0 : index
    %5 = arith.index_cast %1 : i32 to index
    %6 = vector.load %arg4[%c0_1, %c0_2, %5] : memref<1x8x150xf32, #tpu.memory_space<vmem>>, vector<1x8x150xf32>
    %7 = vector.shape_cast %6 : vector<1x8x150xf32> to vector<8x150xf32>
    %8 = vector.extract_strided_slice %7 {offsets = [0, 0], sizes = [8, 128], strides = [1, 1]} : vector<8x150xf32> to vector<8x128xf32>
    %c0_3 = arith.constant 0 : index
    %c0_4 = arith.constant 0 : index
    %c0_5 = arith.constant 0 : index
    %9 = vector.load %arg2[%c0_3, %c0_4, %c0_5] : memref<9x16x8xf32, #tpu.memory_space<vmem>>, vector<1x16x8xf32>
    %10 = vector.shape_cast %9 : vector<1x16x8xf32> to vector<16x8xf32>
    %cst = arith.constant dense<0.000000e+00> : vector<16x128xf32>
    %11 = tpu.matmul %10, %8, %cst {dimension_numbers = #tpu.dot_dimension_numbers<[1], [0], [0], [1], [0, 0, 1, 1], [], []>} : vector<16x8xf32>, vector<8x128xf32>, vector<16x128xf32> -> vector<16x128xf32>
    %12 = arith.addf %4, %11 : vector<16x128xf32>
    %13 = vector.extract_strided_slice %7 {offsets = [0, 1], sizes = [8, 128], strides = [1, 1]} : vector<8x150xf32> to vector<8x128xf32>
    %c1 = arith.constant 1 : index
    %c0_6 = arith.constant 0 : index
    %c0_7 = arith.constant 0 : index
    %14 = vector.load %arg2[%c1, %c0_6, %c0_7] : memref<9x16x8xf32, #tpu.memory_space<vmem>>, vector<1x16x8xf32>
    %15 = vector.shape_cast %14 : vector<1x16x8xf32> to vector<16x8xf32>
    %cst_8 = arith.constant dense<0.000000e+00> : vector<16x128xf32>
    %16 = tpu.matmul %15, %13, %cst_8 {dimension_numbers = #tpu.dot_dimension_numbers<[1], [0], [0], [1], [0, 0, 1, 1], [], []>} : vector<16x8xf32>, vector<8x128xf32>, vector<16x128xf32> -> vector<16x128xf32>
    %17 = arith.addf %12, %16 : vector<16x128xf32>
    %18 = vector.extract_strided_slice %7 {offsets = [0, 2], sizes = [8, 128], strides = [1, 1]} : vector<8x150xf32> to vector<8x128xf32>
    %c2 = arith.constant 2 : index
    %c0_9 = arith.constant 0 : index
    %c0_10 = arith.constant 0 : index
    %19 = vector.load %arg2[%c2, %c0_9, %c0_10] : memref<9x16x8xf32, #tpu.memory_space<vmem>>, vector<1x16x8xf32>
    %20 = vector.shape_cast %19 : vector<1x16x8xf32> to vector<16x8xf32>
    %cst_11 = arith.constant dense<0.000000e+00> : vector<16x128xf32>
    %21 = tpu.matmul %20, %18, %cst_11 {dimension_numbers = #tpu.dot_dimension_numbers<[1], [0], [0], [1], [0, 0, 1, 1], [], []>} : vector<16x8xf32>, vector<8x128xf32>, vector<16x128xf32> -> vector<16x128xf32>
    %22 = arith.addf %17, %21 : vector<16x128xf32>
    %23 = vector.extract_strided_slice %7 {offsets = [0, 10], sizes = [8, 128], strides = [1, 1]} : vector<8x150xf32> to vector<8x128xf32>
    %c3 = arith.constant 3 : index
    %c0_12 = arith.constant 0 : index
    %c0_13 = arith.constant 0 : index
    %24 = vector.load %arg2[%c3, %c0_12, %c0_13] : memref<9x16x8xf32, #tpu.memory_space<vmem>>, vector<1x16x8xf32>
    %25 = vector.shape_cast %24 : vector<1x16x8xf32> to vector<16x8xf32>
    %cst_14 = arith.constant dense<0.000000e+00> : vector<16x128xf32>
    %26 = tpu.matmul %25, %23, %cst_14 {dimension_numbers = #tpu.dot_dimension_numbers<[1], [0], [0], [1], [0, 0, 1, 1], [], []>} : vector<16x8xf32>, vector<8x128xf32>, vector<16x128xf32> -> vector<16x128xf32>
    %27 = arith.addf %22, %26 : vector<16x128xf32>
    %28 = vector.extract_strided_slice %7 {offsets = [0, 11], sizes = [8, 128], strides = [1, 1]} : vector<8x150xf32> to vector<8x128xf32>
    %c4 = arith.constant 4 : index
    %c0_15 = arith.constant 0 : index
    %c0_16 = arith.constant 0 : index
    %29 = vector.load %arg2[%c4, %c0_15, %c0_16] : memref<9x16x8xf32, #tpu.memory_space<vmem>>, vector<1x16x8xf32>
    %30 = vector.shape_cast %29 : vector<1x16x8xf32> to vector<16x8xf32>
    %cst_17 = arith.constant dense<0.000000e+00> : vector<16x128xf32>
    %31 = tpu.matmul %30, %28, %cst_17 {dimension_numbers = #tpu.dot_dimension_numbers<[1], [0], [0], [1], [0, 0, 1, 1], [], []>} : vector<16x8xf32>, vector<8x128xf32>, vector<16x128xf32> -> vector<16x128xf32>
    %32 = arith.addf %27, %31 : vector<16x128xf32>
    %33 = vector.extract_strided_slice %7 {offsets = [0, 12], sizes = [8, 128], strides = [1, 1]} : vector<8x150xf32> to vector<8x128xf32>
    %c5 = arith.constant 5 : index
    %c0_18 = arith.constant 0 : index
    %c0_19 = arith.constant 0 : index
    %34 = vector.load %arg2[%c5, %c0_18, %c0_19] : memref<9x16x8xf32, #tpu.memory_space<vmem>>, vector<1x16x8xf32>
    %35 = vector.shape_cast %34 : vector<1x16x8xf32> to vector<16x8xf32>
    %cst_20 = arith.constant dense<0.000000e+00> : vector<16x128xf32>
    %36 = tpu.matmul %35, %33, %cst_20 {dimension_numbers = #tpu.dot_dimension_numbers<[1], [0], [0], [1], [0, 0, 1, 1], [], []>} : vector<16x8xf32>, vector<8x128xf32>, vector<16x128xf32> -> vector<16x128xf32>
    %37 = arith.addf %32, %36 : vector<16x128xf32>
    %38 = vector.extract_strided_slice %7 {offsets = [0, 20], sizes = [8, 128], strides = [1, 1]} : vector<8x150xf32> to vector<8x128xf32>
    %c6 = arith.constant 6 : index
    %c0_21 = arith.constant 0 : index
    %c0_22 = arith.constant 0 : index
    %39 = vector.load %arg2[%c6, %c0_21, %c0_22] : memref<9x16x8xf32, #tpu.memory_space<vmem>>, vector<1x16x8xf32>
    %40 = vector.shape_cast %39 : vector<1x16x8xf32> to vector<16x8xf32>
    %cst_23 = arith.constant dense<0.000000e+00> : vector<16x128xf32>
    %41 = tpu.matmul %40, %38, %cst_23 {dimension_numbers = #tpu.dot_dimension_numbers<[1], [0], [0], [1], [0, 0, 1, 1], [], []>} : vector<16x8xf32>, vector<8x128xf32>, vector<16x128xf32> -> vector<16x128xf32>
    %42 = arith.addf %37, %41 : vector<16x128xf32>
    %43 = vector.extract_strided_slice %7 {offsets = [0, 21], sizes = [8, 128], strides = [1, 1]} : vector<8x150xf32> to vector<8x128xf32>
    %c7 = arith.constant 7 : index
    %c0_24 = arith.constant 0 : index
    %c0_25 = arith.constant 0 : index
    %44 = vector.load %arg2[%c7, %c0_24, %c0_25] : memref<9x16x8xf32, #tpu.memory_space<vmem>>, vector<1x16x8xf32>
    %45 = vector.shape_cast %44 : vector<1x16x8xf32> to vector<16x8xf32>
    %cst_26 = arith.constant dense<0.000000e+00> : vector<16x128xf32>
    %46 = tpu.matmul %45, %43, %cst_26 {dimension_numbers = #tpu.dot_dimension_numbers<[1], [0], [0], [1], [0, 0, 1, 1], [], []>} : vector<16x8xf32>, vector<8x128xf32>, vector<16x128xf32> -> vector<16x128xf32>
    %47 = arith.addf %42, %46 : vector<16x128xf32>
    %48 = vector.extract_strided_slice %7 {offsets = [0, 22], sizes = [8, 128], strides = [1, 1]} : vector<8x150xf32> to vector<8x128xf32>
    %c8 = arith.constant 8 : index
    %c0_27 = arith.constant 0 : index
    %c0_28 = arith.constant 0 : index
    %49 = vector.load %arg2[%c8, %c0_27, %c0_28] : memref<9x16x8xf32, #tpu.memory_space<vmem>>, vector<1x16x8xf32>
    %50 = vector.shape_cast %49 : vector<1x16x8xf32> to vector<16x8xf32>
    %cst_29 = arith.constant dense<0.000000e+00> : vector<16x128xf32>
    %51 = tpu.matmul %50, %48, %cst_29 {dimension_numbers = #tpu.dot_dimension_numbers<[1], [0], [0], [1], [0, 0, 1, 1], [], []>} : vector<16x8xf32>, vector<8x128xf32>, vector<16x128xf32> -> vector<16x128xf32>
    %52 = arith.addf %47, %51 : vector<16x128xf32>
    %cst_30 = arith.constant 0.000000e+00 : f32
    %53 = vector.broadcast %cst_30 : f32 to vector<16x128xf32>
    %54 = arith.maximumf %52, %53 : vector<16x128xf32>
    %c0_31 = arith.constant 0 : index
    %c0_32 = arith.constant 0 : index
    %c0_33 = arith.constant 0 : index
    %55 = vector.load %arg5[%c0_31, %c0_32, %c0_33] : memref<1x16x128xf32, #tpu.memory_space<vmem>>, vector<1x16x128xf32>
    %56 = vector.shape_cast %55 : vector<1x16x128xf32> to vector<16x128xf32>
    %57 = vector.shape_cast %54 : vector<16x128xf32> to vector<1x16x128xf32>
    tpu.vector_store %arg5[%c0_31, %c0_32, %c0_33], %57 {strides = array<i32>} : memref<1x16x128xf32, #tpu.memory_space<vmem>>, vector<1x16x128xf32>,
    return
  }
  func.func @transform_0(%arg0: i32, %arg1: i32) -> (i32, i32, i32) {
    %c0_i32 = arith.constant 0 : i32
    %c0_i32_0 = arith.constant 0 : i32
    %c0_i32_1 = arith.constant 0 : i32
    %c0_i32_2 = arith.constant 0 : i32
    return %c0_i32, %c0_i32_0, %c0_i32_1 : i32, i32, i32
  }
  func.func @transform_1(%arg0: i32, %arg1: i32) -> (i32, i32) {
    %c0_i32 = arith.constant 0 : i32
    %c0_i32_0 = arith.constant 0 : i32
    %c0_i32_1 = arith.constant 0 : i32
    return %c0_i32, %c0_i32_0 : i32, i32
  }
  func.func @transform_2(%arg0: i32, %arg1: i32) -> (i32, i32, i32) {
    %c0_i32 = arith.constant 0 : i32
    %c0_i32_0 = arith.constant 0 : i32
    %c0_i32_1 = arith.constant 0 : i32
    return %arg0, %c0_i32, %c0_i32_0 : i32, i32, i32
  }
  func.func @transform_3(%arg0: i32, %arg1: i32) -> (i32, i32, i32) {
    %c0_i32 = arith.constant 0 : i32
    %c0_i32_0 = arith.constant 0 : i32
    return %arg0, %c0_i32, %arg1 : i32, i32, i32
  }
}

module attributes {stable_mosaic.version = 11 : i64} {
  func.func @_conv_flat_kernel(%arg0: i32, %arg1: i32, %arg2: memref<9x8x16xf32, #tpu.memory_space<vmem>>, %arg3: memref<9x8x8xf32, #tpu.memory_space<vmem>>, %arg4: memref<8x1xf32, #tpu.memory_space<vmem>>, %arg5: memref<1x16x422xf32, #tpu.memory_space<vmem>>, %arg6: memref<1x8x422xf32, #tpu.memory_space<vmem>>, %arg7: memref<1x8x384xf32, #tpu.memory_space<vmem>>) attributes {dimension_semantics = [#tpu.dimension_semantics<parallel>, #tpu.dimension_semantics<parallel>], iteration_bounds = array<i64: 8, 1>, scalar_prefetch = 0 : i64, scratch_operands = 0 : i64, tpu.core_type = #tpu.core_type<tc>, window_params = [{pipeline_mode = #tpu.pipeline_mode<synchronous>, transform_indices = @transform_0, window_bounds = array<i64: 9, 8, 16>}, {pipeline_mode = #tpu.pipeline_mode<synchronous>, transform_indices = @transform_1, window_bounds = array<i64: 9, 8, 8>}, {pipeline_mode = #tpu.pipeline_mode<synchronous>, transform_indices = @transform_2, window_bounds = array<i64: 8, 1>}, {transform_indices = @transform_3, window_bounds = array<i64: 1, 16, 422>}, {transform_indices = @transform_4, window_bounds = array<i64: 1, 8, 422>}, {transform_indices = @transform_5, window_bounds = array<i64: 1, 8, 384>}]} {
    %c384_i32 = arith.constant 384 : i32
    %0 = arith.muli %arg1, %c384_i32 : i32
    %1 = tpu.assume_multiple %0, 128 : i32
    %c0 = arith.constant 0 : index
    %c0_0 = arith.constant 0 : index
    %2 = vector.load %arg4[%c0, %c0_0] : memref<8x1xf32, #tpu.memory_space<vmem>>, vector<8x1xf32>
    %3 = vector.shape_cast %2 : vector<8x1xf32> to vector<8x1xf32>
    %4 = vector.broadcast %3 : vector<8x1xf32> to vector<8x384xf32>
    %c0_1 = arith.constant 0 : index
    %c0_2 = arith.constant 0 : index
    %5 = arith.index_cast %1 : i32 to index
    %6 = vector.load %arg5[%c0_1, %c0_2, %5] : memref<1x16x422xf32, #tpu.memory_space<vmem>>, vector<1x16x422xf32>
    %7 = vector.shape_cast %6 : vector<1x16x422xf32> to vector<16x422xf32>
    %8 = vector.extract_strided_slice %7 {offsets = [0, 0], sizes = [16, 384], strides = [1, 1]} : vector<16x422xf32> to vector<16x384xf32>
    %c0_3 = arith.constant 0 : index
    %c0_4 = arith.constant 0 : index
    %c0_5 = arith.constant 0 : index
    %9 = vector.load %arg2[%c0_3, %c0_4, %c0_5] : memref<9x8x16xf32, #tpu.memory_space<vmem>>, vector<1x8x16xf32>
    %10 = vector.shape_cast %9 : vector<1x8x16xf32> to vector<8x16xf32>
    %cst = arith.constant dense<0.000000e+00> : vector<8x384xf32>
    %11 = tpu.matmul %10, %8, %cst {dimension_numbers = #tpu.dot_dimension_numbers<[1], [0], [0], [1], [0, 0, 1, 1], [], []>} : vector<8x16xf32>, vector<16x384xf32>, vector<8x384xf32> -> vector<8x384xf32>
    %12 = arith.addf %4, %11 : vector<8x384xf32>
    %13 = vector.extract_strided_slice %7 {offsets = [0, 1], sizes = [16, 384], strides = [1, 1]} : vector<16x422xf32> to vector<16x384xf32>
    %c1 = arith.constant 1 : index
    %c0_6 = arith.constant 0 : index
    %c0_7 = arith.constant 0 : index
    %14 = vector.load %arg2[%c1, %c0_6, %c0_7] : memref<9x8x16xf32, #tpu.memory_space<vmem>>, vector<1x8x16xf32>
    %15 = vector.shape_cast %14 : vector<1x8x16xf32> to vector<8x16xf32>
    %cst_8 = arith.constant dense<0.000000e+00> : vector<8x384xf32>
    %16 = tpu.matmul %15, %13, %cst_8 {dimension_numbers = #tpu.dot_dimension_numbers<[1], [0], [0], [1], [0, 0, 1, 1], [], []>} : vector<8x16xf32>, vector<16x384xf32>, vector<8x384xf32> -> vector<8x384xf32>
    %17 = arith.addf %12, %16 : vector<8x384xf32>
    %18 = vector.extract_strided_slice %7 {offsets = [0, 2], sizes = [16, 384], strides = [1, 1]} : vector<16x422xf32> to vector<16x384xf32>
    %c2 = arith.constant 2 : index
    %c0_9 = arith.constant 0 : index
    %c0_10 = arith.constant 0 : index
    %19 = vector.load %arg2[%c2, %c0_9, %c0_10] : memref<9x8x16xf32, #tpu.memory_space<vmem>>, vector<1x8x16xf32>
    %20 = vector.shape_cast %19 : vector<1x8x16xf32> to vector<8x16xf32>
    %cst_11 = arith.constant dense<0.000000e+00> : vector<8x384xf32>
    %21 = tpu.matmul %20, %18, %cst_11 {dimension_numbers = #tpu.dot_dimension_numbers<[1], [0], [0], [1], [0, 0, 1, 1], [], []>} : vector<8x16xf32>, vector<16x384xf32>, vector<8x384xf32> -> vector<8x384xf32>
    %22 = arith.addf %17, %21 : vector<8x384xf32>
    %23 = vector.extract_strided_slice %7 {offsets = [0, 18], sizes = [16, 384], strides = [1, 1]} : vector<16x422xf32> to vector<16x384xf32>
    %c3 = arith.constant 3 : index
    %c0_12 = arith.constant 0 : index
    %c0_13 = arith.constant 0 : index
    %24 = vector.load %arg2[%c3, %c0_12, %c0_13] : memref<9x8x16xf32, #tpu.memory_space<vmem>>, vector<1x8x16xf32>
    %25 = vector.shape_cast %24 : vector<1x8x16xf32> to vector<8x16xf32>
    %cst_14 = arith.constant dense<0.000000e+00> : vector<8x384xf32>
    %26 = tpu.matmul %25, %23, %cst_14 {dimension_numbers = #tpu.dot_dimension_numbers<[1], [0], [0], [1], [0, 0, 1, 1], [], []>} : vector<8x16xf32>, vector<16x384xf32>, vector<8x384xf32> -> vector<8x384xf32>
    %27 = arith.addf %22, %26 : vector<8x384xf32>
    %28 = vector.extract_strided_slice %7 {offsets = [0, 19], sizes = [16, 384], strides = [1, 1]} : vector<16x422xf32> to vector<16x384xf32>
    %c4 = arith.constant 4 : index
    %c0_15 = arith.constant 0 : index
    %c0_16 = arith.constant 0 : index
    %29 = vector.load %arg2[%c4, %c0_15, %c0_16] : memref<9x8x16xf32, #tpu.memory_space<vmem>>, vector<1x8x16xf32>
    %30 = vector.shape_cast %29 : vector<1x8x16xf32> to vector<8x16xf32>
    %cst_17 = arith.constant dense<0.000000e+00> : vector<8x384xf32>
    %31 = tpu.matmul %30, %28, %cst_17 {dimension_numbers = #tpu.dot_dimension_numbers<[1], [0], [0], [1], [0, 0, 1, 1], [], []>} : vector<8x16xf32>, vector<16x384xf32>, vector<8x384xf32> -> vector<8x384xf32>
    %32 = arith.addf %27, %31 : vector<8x384xf32>
    %33 = vector.extract_strided_slice %7 {offsets = [0, 20], sizes = [16, 384], strides = [1, 1]} : vector<16x422xf32> to vector<16x384xf32>
    %c5 = arith.constant 5 : index
    %c0_18 = arith.constant 0 : index
    %c0_19 = arith.constant 0 : index
    %34 = vector.load %arg2[%c5, %c0_18, %c0_19] : memref<9x8x16xf32, #tpu.memory_space<vmem>>, vector<1x8x16xf32>
    %35 = vector.shape_cast %34 : vector<1x8x16xf32> to vector<8x16xf32>
    %cst_20 = arith.constant dense<0.000000e+00> : vector<8x384xf32>
    %36 = tpu.matmul %35, %33, %cst_20 {dimension_numbers = #tpu.dot_dimension_numbers<[1], [0], [0], [1], [0, 0, 1, 1], [], []>} : vector<8x16xf32>, vector<16x384xf32>, vector<8x384xf32> -> vector<8x384xf32>
    %37 = arith.addf %32, %36 : vector<8x384xf32>
    %38 = vector.extract_strided_slice %7 {offsets = [0, 36], sizes = [16, 384], strides = [1, 1]} : vector<16x422xf32> to vector<16x384xf32>
    %c6 = arith.constant 6 : index
    %c0_21 = arith.constant 0 : index
    %c0_22 = arith.constant 0 : index
    %39 = vector.load %arg2[%c6, %c0_21, %c0_22] : memref<9x8x16xf32, #tpu.memory_space<vmem>>, vector<1x8x16xf32>
    %40 = vector.shape_cast %39 : vector<1x8x16xf32> to vector<8x16xf32>
    %cst_23 = arith.constant dense<0.000000e+00> : vector<8x384xf32>
    %41 = tpu.matmul %40, %38, %cst_23 {dimension_numbers = #tpu.dot_dimension_numbers<[1], [0], [0], [1], [0, 0, 1, 1], [], []>} : vector<8x16xf32>, vector<16x384xf32>, vector<8x384xf32> -> vector<8x384xf32>
    %42 = arith.addf %37, %41 : vector<8x384xf32>
    %43 = vector.extract_strided_slice %7 {offsets = [0, 37], sizes = [16, 384], strides = [1, 1]} : vector<16x422xf32> to vector<16x384xf32>
    %c7 = arith.constant 7 : index
    %c0_24 = arith.constant 0 : index
    %c0_25 = arith.constant 0 : index
    %44 = vector.load %arg2[%c7, %c0_24, %c0_25] : memref<9x8x16xf32, #tpu.memory_space<vmem>>, vector<1x8x16xf32>
    %45 = vector.shape_cast %44 : vector<1x8x16xf32> to vector<8x16xf32>
    %cst_26 = arith.constant dense<0.000000e+00> : vector<8x384xf32>
    %46 = tpu.matmul %45, %43, %cst_26 {dimension_numbers = #tpu.dot_dimension_numbers<[1], [0], [0], [1], [0, 0, 1, 1], [], []>} : vector<8x16xf32>, vector<16x384xf32>, vector<8x384xf32> -> vector<8x384xf32>
    %47 = arith.addf %42, %46 : vector<8x384xf32>
    %48 = vector.extract_strided_slice %7 {offsets = [0, 38], sizes = [16, 384], strides = [1, 1]} : vector<16x422xf32> to vector<16x384xf32>
    %c8 = arith.constant 8 : index
    %c0_27 = arith.constant 0 : index
    %c0_28 = arith.constant 0 : index
    %49 = vector.load %arg2[%c8, %c0_27, %c0_28] : memref<9x8x16xf32, #tpu.memory_space<vmem>>, vector<1x8x16xf32>
    %50 = vector.shape_cast %49 : vector<1x8x16xf32> to vector<8x16xf32>
    %cst_29 = arith.constant dense<0.000000e+00> : vector<8x384xf32>
    %51 = tpu.matmul %50, %48, %cst_29 {dimension_numbers = #tpu.dot_dimension_numbers<[1], [0], [0], [1], [0, 0, 1, 1], [], []>} : vector<8x16xf32>, vector<16x384xf32>, vector<8x384xf32> -> vector<8x384xf32>
    %52 = arith.addf %47, %51 : vector<8x384xf32>
    %c0_30 = arith.constant 0 : index
    %c0_31 = arith.constant 0 : index
    %53 = arith.index_cast %1 : i32 to index
    %54 = vector.load %arg6[%c0_30, %c0_31, %53] : memref<1x8x422xf32, #tpu.memory_space<vmem>>, vector<1x8x422xf32>
    %55 = vector.shape_cast %54 : vector<1x8x422xf32> to vector<8x422xf32>
    %56 = vector.extract_strided_slice %55 {offsets = [0, 0], sizes = [8, 384], strides = [1, 1]} : vector<8x422xf32> to vector<8x384xf32>
    %c0_32 = arith.constant 0 : index
    %c0_33 = arith.constant 0 : index
    %c0_34 = arith.constant 0 : index
    %57 = vector.load %arg3[%c0_32, %c0_33, %c0_34] : memref<9x8x8xf32, #tpu.memory_space<vmem>>, vector<1x8x8xf32>
    %58 = vector.shape_cast %57 : vector<1x8x8xf32> to vector<8x8xf32>
    %cst_35 = arith.constant dense<0.000000e+00> : vector<8x384xf32>
    %59 = tpu.matmul %58, %56, %cst_35 {dimension_numbers = #tpu.dot_dimension_numbers<[1], [0], [0], [1], [0, 0, 1, 1], [], []>} : vector<8x8xf32>, vector<8x384xf32>, vector<8x384xf32> -> vector<8x384xf32>
    %60 = arith.addf %52, %59 : vector<8x384xf32>
    %61 = vector.extract_strided_slice %55 {offsets = [0, 1], sizes = [8, 384], strides = [1, 1]} : vector<8x422xf32> to vector<8x384xf32>
    %c1_36 = arith.constant 1 : index
    %c0_37 = arith.constant 0 : index
    %c0_38 = arith.constant 0 : index
    %62 = vector.load %arg3[%c1_36, %c0_37, %c0_38] : memref<9x8x8xf32, #tpu.memory_space<vmem>>, vector<1x8x8xf32>
    %63 = vector.shape_cast %62 : vector<1x8x8xf32> to vector<8x8xf32>
    %cst_39 = arith.constant dense<0.000000e+00> : vector<8x384xf32>
    %64 = tpu.matmul %63, %61, %cst_39 {dimension_numbers = #tpu.dot_dimension_numbers<[1], [0], [0], [1], [0, 0, 1, 1], [], []>} : vector<8x8xf32>, vector<8x384xf32>, vector<8x384xf32> -> vector<8x384xf32>
    %65 = arith.addf %60, %64 : vector<8x384xf32>
    %66 = vector.extract_strided_slice %55 {offsets = [0, 2], sizes = [8, 384], strides = [1, 1]} : vector<8x422xf32> to vector<8x384xf32>
    %c2_40 = arith.constant 2 : index
    %c0_41 = arith.constant 0 : index
    %c0_42 = arith.constant 0 : index
    %67 = vector.load %arg3[%c2_40, %c0_41, %c0_42] : memref<9x8x8xf32, #tpu.memory_space<vmem>>, vector<1x8x8xf32>
    %68 = vector.shape_cast %67 : vector<1x8x8xf32> to vector<8x8xf32>
    %cst_43 = arith.constant dense<0.000000e+00> : vector<8x384xf32>
    %69 = tpu.matmul %68, %66, %cst_43 {dimension_numbers = #tpu.dot_dimension_numbers<[1], [0], [0], [1], [0, 0, 1, 1], [], []>} : vector<8x8xf32>, vector<8x384xf32>, vector<8x384xf32> -> vector<8x384xf32>
    %70 = arith.addf %65, %69 : vector<8x384xf32>
    %71 = vector.extract_strided_slice %55 {offsets = [0, 18], sizes = [8, 384], strides = [1, 1]} : vector<8x422xf32> to vector<8x384xf32>
    %c3_44 = arith.constant 3 : index
    %c0_45 = arith.constant 0 : index
    %c0_46 = arith.constant 0 : index
    %72 = vector.load %arg3[%c3_44, %c0_45, %c0_46] : memref<9x8x8xf32, #tpu.memory_space<vmem>>, vector<1x8x8xf32>
    %73 = vector.shape_cast %72 : vector<1x8x8xf32> to vector<8x8xf32>
    %cst_47 = arith.constant dense<0.000000e+00> : vector<8x384xf32>
    %74 = tpu.matmul %73, %71, %cst_47 {dimension_numbers = #tpu.dot_dimension_numbers<[1], [0], [0], [1], [0, 0, 1, 1], [], []>} : vector<8x8xf32>, vector<8x384xf32>, vector<8x384xf32> -> vector<8x384xf32>
    %75 = arith.addf %70, %74 : vector<8x384xf32>
    %76 = vector.extract_strided_slice %55 {offsets = [0, 19], sizes = [8, 384], strides = [1, 1]} : vector<8x422xf32> to vector<8x384xf32>
    %c4_48 = arith.constant 4 : index
    %c0_49 = arith.constant 0 : index
    %c0_50 = arith.constant 0 : index
    %77 = vector.load %arg3[%c4_48, %c0_49, %c0_50] : memref<9x8x8xf32, #tpu.memory_space<vmem>>, vector<1x8x8xf32>
    %78 = vector.shape_cast %77 : vector<1x8x8xf32> to vector<8x8xf32>
    %cst_51 = arith.constant dense<0.000000e+00> : vector<8x384xf32>
    %79 = tpu.matmul %78, %76, %cst_51 {dimension_numbers = #tpu.dot_dimension_numbers<[1], [0], [0], [1], [0, 0, 1, 1], [], []>} : vector<8x8xf32>, vector<8x384xf32>, vector<8x384xf32> -> vector<8x384xf32>
    %80 = arith.addf %75, %79 : vector<8x384xf32>
    %81 = vector.extract_strided_slice %55 {offsets = [0, 20], sizes = [8, 384], strides = [1, 1]} : vector<8x422xf32> to vector<8x384xf32>
    %c5_52 = arith.constant 5 : index
    %c0_53 = arith.constant 0 : index
    %c0_54 = arith.constant 0 : index
    %82 = vector.load %arg3[%c5_52, %c0_53, %c0_54] : memref<9x8x8xf32, #tpu.memory_space<vmem>>, vector<1x8x8xf32>
    %83 = vector.shape_cast %82 : vector<1x8x8xf32> to vector<8x8xf32>
    %cst_55 = arith.constant dense<0.000000e+00> : vector<8x384xf32>
    %84 = tpu.matmul %83, %81, %cst_55 {dimension_numbers = #tpu.dot_dimension_numbers<[1], [0], [0], [1], [0, 0, 1, 1], [], []>} : vector<8x8xf32>, vector<8x384xf32>, vector<8x384xf32> -> vector<8x384xf32>
    %85 = arith.addf %80, %84 : vector<8x384xf32>
    %86 = vector.extract_strided_slice %55 {offsets = [0, 36], sizes = [8, 384], strides = [1, 1]} : vector<8x422xf32> to vector<8x384xf32>
    %c6_56 = arith.constant 6 : index
    %c0_57 = arith.constant 0 : index
    %c0_58 = arith.constant 0 : index
    %87 = vector.load %arg3[%c6_56, %c0_57, %c0_58] : memref<9x8x8xf32, #tpu.memory_space<vmem>>, vector<1x8x8xf32>
    %88 = vector.shape_cast %87 : vector<1x8x8xf32> to vector<8x8xf32>
    %cst_59 = arith.constant dense<0.000000e+00> : vector<8x384xf32>
    %89 = tpu.matmul %88, %86, %cst_59 {dimension_numbers = #tpu.dot_dimension_numbers<[1], [0], [0], [1], [0, 0, 1, 1], [], []>} : vector<8x8xf32>, vector<8x384xf32>, vector<8x384xf32> -> vector<8x384xf32>
    %90 = arith.addf %85, %89 : vector<8x384xf32>
    %91 = vector.extract_strided_slice %55 {offsets = [0, 37], sizes = [8, 384], strides = [1, 1]} : vector<8x422xf32> to vector<8x384xf32>
    %c7_60 = arith.constant 7 : index
    %c0_61 = arith.constant 0 : index
    %c0_62 = arith.constant 0 : index
    %92 = vector.load %arg3[%c7_60, %c0_61, %c0_62] : memref<9x8x8xf32, #tpu.memory_space<vmem>>, vector<1x8x8xf32>
    %93 = vector.shape_cast %92 : vector<1x8x8xf32> to vector<8x8xf32>
    %cst_63 = arith.constant dense<0.000000e+00> : vector<8x384xf32>
    %94 = tpu.matmul %93, %91, %cst_63 {dimension_numbers = #tpu.dot_dimension_numbers<[1], [0], [0], [1], [0, 0, 1, 1], [], []>} : vector<8x8xf32>, vector<8x384xf32>, vector<8x384xf32> -> vector<8x384xf32>
    %95 = arith.addf %90, %94 : vector<8x384xf32>
    %96 = vector.extract_strided_slice %55 {offsets = [0, 38], sizes = [8, 384], strides = [1, 1]} : vector<8x422xf32> to vector<8x384xf32>
    %c8_64 = arith.constant 8 : index
    %c0_65 = arith.constant 0 : index
    %c0_66 = arith.constant 0 : index
    %97 = vector.load %arg3[%c8_64, %c0_65, %c0_66] : memref<9x8x8xf32, #tpu.memory_space<vmem>>, vector<1x8x8xf32>
    %98 = vector.shape_cast %97 : vector<1x8x8xf32> to vector<8x8xf32>
    %cst_67 = arith.constant dense<0.000000e+00> : vector<8x384xf32>
    %99 = tpu.matmul %98, %96, %cst_67 {dimension_numbers = #tpu.dot_dimension_numbers<[1], [0], [0], [1], [0, 0, 1, 1], [], []>} : vector<8x8xf32>, vector<8x384xf32>, vector<8x384xf32> -> vector<8x384xf32>
    %100 = arith.addf %95, %99 : vector<8x384xf32>
    %cst_68 = arith.constant 0.000000e+00 : f32
    %101 = vector.broadcast %cst_68 : f32 to vector<8x384xf32>
    %102 = arith.maximumf %100, %101 : vector<8x384xf32>
    %c0_69 = arith.constant 0 : index
    %c0_70 = arith.constant 0 : index
    %c0_71 = arith.constant 0 : index
    %103 = vector.load %arg7[%c0_69, %c0_70, %c0_71] : memref<1x8x384xf32, #tpu.memory_space<vmem>>, vector<1x8x384xf32>
    %104 = vector.shape_cast %103 : vector<1x8x384xf32> to vector<8x384xf32>
    %105 = vector.shape_cast %102 : vector<8x384xf32> to vector<1x8x384xf32>
    tpu.vector_store %arg7[%c0_69, %c0_70, %c0_71], %105 {strides = array<i32>} : memref<1x8x384xf32, #tpu.memory_space<vmem>>, vector<1x8x384xf32>,
    return
  }
  func.func @transform_0(%arg0: i32, %arg1: i32) -> (i32, i32, i32) {
    %c0_i32 = arith.constant 0 : i32
    %c0_i32_0 = arith.constant 0 : i32
    %c0_i32_1 = arith.constant 0 : i32
    %c0_i32_2 = arith.constant 0 : i32
    return %c0_i32, %c0_i32_0, %c0_i32_1 : i32, i32, i32
  }
  func.func @transform_1(%arg0: i32, %arg1: i32) -> (i32, i32, i32) {
    %c0_i32 = arith.constant 0 : i32
    %c0_i32_0 = arith.constant 0 : i32
    %c0_i32_1 = arith.constant 0 : i32
    %c0_i32_2 = arith.constant 0 : i32
    return %c0_i32, %c0_i32_0, %c0_i32_1 : i32, i32, i32
  }
  func.func @transform_2(%arg0: i32, %arg1: i32) -> (i32, i32) {
    %c0_i32 = arith.constant 0 : i32
    %c0_i32_0 = arith.constant 0 : i32
    %c0_i32_1 = arith.constant 0 : i32
    return %c0_i32, %c0_i32_0 : i32, i32
  }
  func.func @transform_3(%arg0: i32, %arg1: i32) -> (i32, i32, i32) {
    %c0_i32 = arith.constant 0 : i32
    %c0_i32_0 = arith.constant 0 : i32
    %c0_i32_1 = arith.constant 0 : i32
    return %arg0, %c0_i32, %c0_i32_0 : i32, i32, i32
  }
  func.func @transform_4(%arg0: i32, %arg1: i32) -> (i32, i32, i32) {
    %c0_i32 = arith.constant 0 : i32
    %c0_i32_0 = arith.constant 0 : i32
    %c0_i32_1 = arith.constant 0 : i32
    return %arg0, %c0_i32, %c0_i32_0 : i32, i32, i32
  }
  func.func @transform_5(%arg0: i32, %arg1: i32) -> (i32, i32, i32) {
    %c0_i32 = arith.constant 0 : i32
    %c0_i32_0 = arith.constant 0 : i32
    return %arg0, %c0_i32, %arg1 : i32, i32, i32
  }
}

module attributes {stable_mosaic.version = 11 : i64} {
  func.func @_conv_flat_kernel(%arg0: i32, %arg1: i32, %arg2: memref<1x2x8xf32, #tpu.memory_space<vmem>>, %arg3: memref<2x1xf32, #tpu.memory_space<vmem>>, %arg4: memref<1x8x256xf32, #tpu.memory_space<vmem>>, %arg5: memref<1x2x256xf32, #tpu.memory_space<vmem>>) attributes {dimension_semantics = [#tpu.dimension_semantics<parallel>, #tpu.dimension_semantics<parallel>], iteration_bounds = array<i64: 8, 1>, scalar_prefetch = 0 : i64, scratch_operands = 0 : i64, tpu.core_type = #tpu.core_type<tc>, window_params = [{pipeline_mode = #tpu.pipeline_mode<synchronous>, transform_indices = @transform_0, window_bounds = array<i64: 1, 2, 8>}, {pipeline_mode = #tpu.pipeline_mode<synchronous>, transform_indices = @transform_1, window_bounds = array<i64: 2, 1>}, {transform_indices = @transform_2, window_bounds = array<i64: 1, 8, 256>}, {transform_indices = @transform_3, window_bounds = array<i64: 1, 2, 256>}]} {
    %c256_i32 = arith.constant 256 : i32
    %0 = arith.muli %arg1, %c256_i32 : i32
    %1 = tpu.assume_multiple %0, 128 : i32
    %c0 = arith.constant 0 : index
    %c0_0 = arith.constant 0 : index
    %2 = vector.load %arg3[%c0, %c0_0] : memref<2x1xf32, #tpu.memory_space<vmem>>, vector<2x1xf32>
    %3 = vector.shape_cast %2 : vector<2x1xf32> to vector<2x1xf32>
    %4 = vector.broadcast %3 : vector<2x1xf32> to vector<2x256xf32>
    %c0_1 = arith.constant 0 : index
    %c0_2 = arith.constant 0 : index
    %5 = arith.index_cast %1 : i32 to index
    %6 = vector.load %arg4[%c0_1, %c0_2, %5] : memref<1x8x256xf32, #tpu.memory_space<vmem>>, vector<1x8x256xf32>
    %7 = vector.shape_cast %6 : vector<1x8x256xf32> to vector<8x256xf32>
    %c0_3 = arith.constant 0 : index
    %c0_4 = arith.constant 0 : index
    %c0_5 = arith.constant 0 : index
    %8 = vector.load %arg2[%c0_3, %c0_4, %c0_5] : memref<1x2x8xf32, #tpu.memory_space<vmem>>, vector<1x2x8xf32>
    %9 = vector.shape_cast %8 : vector<1x2x8xf32> to vector<2x8xf32>
    %cst = arith.constant dense<0.000000e+00> : vector<2x256xf32>
    %10 = tpu.matmul %9, %7, %cst {dimension_numbers = #tpu.dot_dimension_numbers<[1], [0], [0], [1], [0, 0, 1, 1], [], []>} : vector<2x8xf32>, vector<8x256xf32>, vector<2x256xf32> -> vector<2x256xf32>
    %11 = arith.addf %4, %10 : vector<2x256xf32>
    %c0_6 = arith.constant 0 : index
    %c0_7 = arith.constant 0 : index
    %c0_8 = arith.constant 0 : index
    %12 = vector.load %arg5[%c0_6, %c0_7, %c0_8] : memref<1x2x256xf32, #tpu.memory_space<vmem>>, vector<1x2x256xf32>
    %13 = vector.shape_cast %12 : vector<1x2x256xf32> to vector<2x256xf32>
    %14 = vector.shape_cast %11 : vector<2x256xf32> to vector<1x2x256xf32>
    tpu.vector_store %arg5[%c0_6, %c0_7, %c0_8], %14 {strides = array<i32>} : memref<1x2x256xf32, #tpu.memory_space<vmem>>, vector<1x2x256xf32>,
    return
  }
  func.func @transform_0(%arg0: i32, %arg1: i32) -> (i32, i32, i32) {
    %c0_i32 = arith.constant 0 : i32
    %c0_i32_0 = arith.constant 0 : i32
    %c0_i32_1 = arith.constant 0 : i32
    %c0_i32_2 = arith.constant 0 : i32
    return %c0_i32, %c0_i32_0, %c0_i32_1 : i32, i32, i32
  }
  func.func @transform_1(%arg0: i32, %arg1: i32) -> (i32, i32) {
    %c0_i32 = arith.constant 0 : i32
    %c0_i32_0 = arith.constant 0 : i32
    %c0_i32_1 = arith.constant 0 : i32
    return %c0_i32, %c0_i32_0 : i32, i32
  }
  func.func @transform_2(%arg0: i32, %arg1: i32) -> (i32, i32, i32) {
    %c0_i32 = arith.constant 0 : i32
    %c0_i32_0 = arith.constant 0 : i32
    %c0_i32_1 = arith.constant 0 : i32
    return %arg0, %c0_i32, %c0_i32_0 : i32, i32, i32
  }
  func.func @transform_3(%arg0: i32, %arg1: i32) -> (i32, i32, i32) {
    %c0_i32 = arith.constant 0 : i32
    %c0_i32_0 = arith.constant 0 : i32
    return %arg0, %c0_i32, %arg1 : i32, i32, i32
  }
}

module attributes {stable_mosaic.version = 11 : i64} {
  func.func @_rss_divide_kernel(%arg0: i32, %arg1: i32, %arg2: memref<1x8x16x16xf32, #tpu.memory_space<vmem>>, %arg3: memref<1x8x16x16xf32, #tpu.memory_space<vmem>>) attributes {dimension_semantics = [#tpu.dimension_semantics<parallel>, #tpu.dimension_semantics<parallel>], iteration_bounds = array<i64: 2, 1>, scalar_prefetch = 0 : i64, scratch_operands = 0 : i64, tpu.core_type = #tpu.core_type<tc>, window_params = [{transform_indices = @transform_0, window_bounds = array<i64: 1, 8, 16, 16>}, {transform_indices = @transform_1, window_bounds = array<i64: 1, 8, 16, 16>}]} {
    %c0 = arith.constant 0 : index
    %c0_0 = arith.constant 0 : index
    %c0_1 = arith.constant 0 : index
    %c0_2 = arith.constant 0 : index
    %0 = vector.load %arg2[%c0, %c0_0, %c0_1, %c0_2] : memref<1x8x16x16xf32, #tpu.memory_space<vmem>>, vector<1x8x16x16xf32>
    %1 = arith.mulf %0, %0 : vector<1x8x16x16xf32>
    %cst = arith.constant dense<0.000000e+00> : vector<1x16x16xf32>
    %2 = vector.multi_reduction <add>, %1, %cst [1] : vector<1x8x16x16xf32> to vector<1x16x16xf32>
    %3 = vector.shape_cast %2 : vector<1x16x16xf32> to vector<1x1x16x16xf32>
    %cst_3 = arith.constant 9.99999996E-13 : f32
    %4 = vector.broadcast %cst_3 : f32 to vector<1x1x16x16xf32>
    %5 = arith.addf %3, %4 : vector<1x1x16x16xf32>
    %6 = math.rsqrt %5 : vector<1x1x16x16xf32>
    %7 = vector.broadcast %6 : vector<1x1x16x16xf32> to vector<1x8x16x16xf32>
    %8 = arith.mulf %0, %7 : vector<1x8x16x16xf32>
    %c0_4 = arith.constant 0 : index
    %c0_5 = arith.constant 0 : index
    %c0_6 = arith.constant 0 : index
    %c0_7 = arith.constant 0 : index
    %9 = vector.load %arg3[%c0_4, %c0_5, %c0_6, %c0_7] : memref<1x8x16x16xf32, #tpu.memory_space<vmem>>, vector<1x8x16x16xf32>
    tpu.vector_store %arg3[%c0_4, %c0_5, %c0_6, %c0_7], %8 {strides = array<i32>} : memref<1x8x16x16xf32, #tpu.memory_space<vmem>>, vector<1x8x16x16xf32>,
    return
  }
  func.func @transform_0(%arg0: i32, %arg1: i32) -> (i32, i32, i32, i32) {
    %c0_i32 = arith.constant 0 : i32
    %c0_i32_0 = arith.constant 0 : i32
    %c0_i32_1 = arith.constant 0 : i32
    return %arg0, %c0_i32, %arg1, %c0_i32_0 : i32, i32, i32, i32
  }
  func.func @transform_1(%arg0: i32, %arg1: i32) -> (i32, i32, i32, i32) {
    %c0_i32 = arith.constant 0 : i32
    %c0_i32_0 = arith.constant 0 : i32
    %c0_i32_1 = arith.constant 0 : i32
    return %arg0, %c0_i32, %arg1, %c0_i32_0 : i32, i32, i32, i32
  }
}

</mosaic_0001>

<bundles_post_ra>
// kernel: _lambda_.5
= control target key start
LH: loop header
LB: loop body
LE: loop exit
PB: predicated region body
PF: predicated region fallthrough
CT: control target
= control target key end

     0   :  { %s2062_s12 = smov 0   ;;  %s2064_s13 = smov 0   ;;  %s2210_s0 = inlined_call_operand.vmem [shape: f32[9,8,2], index: 0, kind: input, shape index: {}]   ;;  %s2211_s1 = inlined_call_operand.vmem [shape: f32[8,1], index: 1, kind: input, shape index: {}]   ;;  %s2212_s2 = inlined_call_operand.vmem [shape: f32[8,2,422], index: 2, kind: input, shape index: {}]   ;;  %s2213_s3 = inlined_call_operand.vmem [shape: f32[8,8,384], index: 3, kind: output, shape index: {}]  }
   0x1   :  { %s2066_s14 = smov 0  }
   0x2 LB: > { %s25_s15 = sadd.s32 1, %s2024_s13  ;;  %p1809_p0 = scmp.ge.s32.totalorder %s2028_s14, 1  ;;  %s2028_s14 = sphi %s2066_s14, %s13_s14   ;;  %s2024_s13 = sphi %s2064_s13, %s2215_s13   ;;  %s2020_s12 = sphi %s2062_s12, %s2214_s12  }
   0x3   : > { %p27_p1 = scmp.ge.s32.totalorder %s25_s15, 8  ;;  %p151_p2 = scmp.lt.s32.totalorder %s2028_s14, 9 }
   0x5   : > { %s2217_s15 = smov (%p27_p1, %s25_s15), 0  ;;  %p152_p3 = pnand %p1809_p0, %p151_p2 }
   0x6   : > { %p179_p4 = scmp.lt.s32.totalorder (!%p152_p3), %s2020_s12, 7  ;;  %v212_v0 = vlaneseq (!%p152_p3)  ;;  %v2030_v1 = vmov (!%p152_p3), 1983009808   ;;  %v2031_v3 = vmov (!%p152_p3), 0.0   ;;  %vm2032_vm0 = vmmov (!%p152_p3), 0   ;;  %s2033_s20 = smov (!%p152_p3), 127  }
   0x7   : > { %155 = sbr.rel (%p152_p3) target bundleno = 418 (0x1a2), region = 32  ;;  %v210_v2 = vunpack.c.l.s4 (!%p152_p3), %v2030_v1  ;;  %1887 = vmatprep.subr.mxu1 (!%p152_p3), %v2031_v3  ;;  %1889 = vmatprep.mubr.msk.f32.mxu1 (!%p152_p3), %vm2032_vm0, %v2031_v3  ;;  %vm228_vm1 = vcmask (!%p152_p3), 1041408   ;;  %v206_v12 = vld [vmem:[%s2210_s0] sm:$0xff] (!%p152_p3)  ;;  %vm224_vm2 = vcmask (!%p152_p3), 15360   ;;  %s2034_s23 = smov (!%p152_p3), 126   ;;  %v2040_v14 = vmov (!%p152_p3), 0  }
   0x8   : > { %v213_v4 = vshrl.u32 (!%p152_p3), %v212_v0, 7  ;;  %299 = vmatprep.mubr.f32.mxu0 (!%p152_p3), %v2031_v3  ;;  %s2035_s24 = smov (!%p152_p3), 110   ;;  %s2036_s25 = smov (!%p152_p3), 109   ;;  %2004 = vset.pattern.permute.xlu0 (!%p152_p3), %v2040_v14  ;;  %v195_v15 = vld [vmem:[%s2211_s1] sm:$0xff] (!%p152_p3)  ;;  %vm390_vm3 = vcmask (!%p152_p3), 1039360   ;;  %v1818_v20 = vld [vmem:[%s2210_s0 + $0x8] sm:$0xff] (!%p152_p3) }
   0x9   : > { %v211_v5 = vunpack.c.0.s8 (!%p152_p3), %v210_v2  ;;  %s2037_s26 = smov (!%p152_p3), 108   ;;  %s2038_s27 = smov (!%p152_p3), 92   ;;  %vm557_vm4 = vcmask (!%p152_p3), 1031168   ;;  %v1824_v30 = vld [vmem:[%s2210_s0 + $0x10] sm:$0xff] (!%p152_p3)  ;;  %vm724_vm5 = vcmask (!%p152_p3), 900096   ;;  %v1830_v38 = vld [vmem:[%s2210_s0 + $0x18] sm:$0xff] (!%p152_p3) }
   0xa   : > { %s2039_s28 = smov (!%p152_p3), 91   ;;  %s2041_s29 = smov (!%p152_p3), 90   ;;  %vm891_vm6 = vcmask (!%p152_p3), 891904   ;;  %v1836_v46 = vld [vmem:[%s2210_s0 + $0x20] sm:$0xff] (!%p152_p3)  ;;  %vm1058_vm7 = vcmask (!%p152_p3), 883712   ;;  %v1842_v54 = vld [vmem:[%s2210_s0 + $0x28] sm:$0xff] (!%p152_p3) }
   0xb   : > { %v214_v6 = vsub.s32 (!%p152_p3), %v211_v5, %v213_v4  ;;  %vm1225_vm8 = vcmask (!%p152_p3), 752640   ;;  %v1848_v62 = vld [vmem:[%s2210_s0 + $0x30] sm:$0xff] (!%p152_p3)  ;;  %vm1392_vm9 = vcmask (!%p152_p3), 744448   ;;  %vm1559_vm10 = vcmask (!%p152_p3), 736256  }
   0xe   : > { %s2219_s12 = smov (!%p179_p4, %s2020_s12), 7 }
   0xf   : > { %s1868_s16 = sshll.u32 %s2219_s12, 3 }
  0x10   : > { %s183_s19 = scalar_lea.vmem %s2212_s2, %s1868_s16 }
  0x11   : > { %v205_v7 = vld [vmem:[%s183_s19] sm:$0xff] }
  0x12   : > { %v215_v8 = vrot.slane %v205_v7, %v214_v6  ;;  %v208_v9 = vcombine.high %v205_v7, %v205_v7  ;;  %v1854_v7 = vld [vmem:[%s2210_s0 + $0x38] sm:$0xff] }
  0x14   : > { %382 = vrot.lane.b32.xlu1 %v215_v8, %s2033_s20  ;;  %v222_v10 = vrot.slane %v208_v9, %v214_v6  ;;  %v223_v11 = vcombine.high %v215_v8, %v215_v8 }
  0x16   : > { %384 = vrot.lane.b32.xlu0 %v223_v11, %s2033_s20  ;;  %v381_v13 = vcombine.high %v222_v10, %v222_v10  ;;  %1813 = vmatprep.subr.msk.mxu0 %vm228_vm1, %v223_v11 }
  0x17   : > { %1888 = vmatpush3.msk.msra.mxu1 %vm228_vm1, %v222_v10  ;;  %1814 = vmatpush1.msk.msra.mxu0 %vm228_vm1, %v215_v8 }
  0x18   : > { %388 = vrot.lane.b32.xlu1 %v381_v13, %s2033_s20  ;;  %1890 = vmatmul.mubr.msk.f32.vlgmr.msra.gmra.mrb[0].mxu1 %vm224_vm2, %v206_v12 }
  0x19   : > { %1815 = vmatmul.mubr.msk.f32.vlgmr.msra.gmra.mrb[0].mxu0 %vm224_vm2, %v206_v12  ;;  %1892 = vmatprep.subr.mxu1 %v2031_v3 }
  0x1a   : > { %386 = vrot.lane.b32.xlu0 %v222_v10, %s2033_s20  ;;  %1894 = vmatprep.mubr.msk.f32.mxu1 %vm2032_vm0, %v2031_v3 }
  0x1b   : > { %467 = vmatprep.mubr.f32.mxu0 %v2031_v3 }
  0x1c   : > { %553 = vrot.lane.b32.xlu1 %v222_v10, %s2034_s23 }
  0x1e   : > { %551 = vrot.lane.b32.xlu0 %v223_v11, %s2034_s23 }
  0x20   : > { %555 = vrot.lane.b32.xlu1 %v381_v13, %s2034_s23 }
  0x22   : > { %549 = vrot.lane.b32.xlu0 %v215_v8, %s2034_s23 }
  0x24   : > { %720 = vrot.lane.b32.xlu1 %v222_v10, %s2035_s24 }
  0x26   : > { %718 = vrot.lane.b32.xlu0 %v223_v11, %s2035_s24 }
  0x28   : > { %722 = vrot.lane.b32.xlu1 %v381_v13, %s2035_s24 }
  0x2a   : > { %716 = vrot.lane.b32.xlu0 %v215_v8, %s2035_s24 }
  0x2c   : > { %887 = vrot.lane.b32.xlu1 %v222_v10, %s2036_s25 }
  0x2e   : > { %885 = vrot.lane.b32.xlu0 %v223_v11, %s2036_s25 }
  0x30   : > { %889 = vrot.lane.b32.xlu1 %v381_v13, %s2036_s25 }
  0x32   : > { %883 = vrot.lane.b32.xlu0 %v215_v8, %s2036_s25  ;;  %s1967_s25 = smul.u32 24, %s2219_s12 }
  0x34   : > { %1054 = vrot.lane.b32.xlu1 %v222_v10, %s2037_s26 }
  0x36   : > { %1052 = vrot.lane.b32.xlu0 %v223_v11, %s2037_s26 }
  0x38   : > { %1056 = vrot.lane.b32.xlu1 %v381_v13, %s2037_s26 }
  0x3a   : > { %1050 = vrot.lane.b32.xlu0 %v215_v8, %s2037_s26 }
  0x3c   : > { %1221 = vrot.lane.b32.xlu1 %v222_v10, %s2038_s27 }
  0x3e   : > { %1219 = vrot.lane.b32.xlu0 %v223_v11, %s2038_s27 }
  0x40   : > { %1223 = vrot.lane.b32.xlu1 %v381_v13, %s2038_s27 }
  0x42   : > { %1217 = vrot.lane.b32.xlu0 %v215_v8, %s2038_s27 }
  0x44   : > { %1388 = vrot.lane.b32.xlu1 %v222_v10, %s2039_s28 }
  0x46   : > { %1386 = vrot.lane.b32.xlu0 %v223_v11, %s2039_s28 }
  0x48   : > { %1390 = vrot.lane.b32.xlu1 %v381_v13, %s2039_s28 }
  0x4a   : > { %1384 = vrot.lane.b32.xlu0 %v215_v8, %s2039_s28  ;;  %s192_s28 = scalar_lea.vmem %s2213_s3, %s1967_s25 }
  0x4c   : > { %1555 = vrot.lane.b32.xlu1 %v222_v10, %s2041_s29 }
  0x4e   : > { %1553 = vrot.lane.b32.xlu0 %v223_v11, %s2041_s29 }
  0x50   : > { %1557 = vrot.lane.b32.xlu1 %v381_v13, %s2041_s29 }
  0x52   : > { %1551 = vrot.lane.b32.xlu0 %v215_v8, %s2041_s29 }
  0x56   : > { %198 = vperm.xlu0 %2004, %v195_v15   ;;  %v1860_v15 = vld [vmem:[%s2210_s0 + $0x40] sm:$0xff] }
  0x86   : > { %v383_v16 = vpop.permute.xlu1 %382 }
  0x88   : > { %v385_v17 = vpop.permute.xlu0 %384 }
  0x89   : > { %v391_v23 = vsel %vm390_vm3, %v383_v16, %v385_v17 }
  0x8a   : > { %v389_v18 = vpop.permute.xlu1 %388 }
  0x8c   : > { %v387_v19 = vpop.permute.xlu0 %386 }
  0x8d   : > { %v392_v21 = vsel %vm390_vm3, %v385_v17, %v387_v19  ;;  %v393_v22 = vsel %vm390_vm3, %v387_v19, %v389_v18 }
  0x8e   : > { %1819 = vmatprep.subr.msk.mxu0 %vm228_vm1, %v392_v21  ;;  %v554_v24 = vpop.permute.xlu1 %553  ;;  %1893 = vmatpush3.msk.msra.mxu1 %vm228_vm1, %v393_v22 }
  0x8f   : > { %1820 = vmatpush1.msk.msra.mxu0 %vm228_vm1, %v391_v23  ;;  %1895 = vmatmul.mubr.msk.f32.vlgmr.msra.gmra.mrb[0].mxu1 %vm224_vm2, %v1818_v20 }
  0x90   : > { %1821 = vmatmul.mubr.msk.f32.vlgmr.msra.gmra.mrb[0].mxu0 %vm224_vm2, %v1818_v20  ;;  %v552_v25 = vpop.permute.xlu0 %551  ;;  %1897 = vmatprep.subr.mxu1 %v2031_v3 }
  0x91   : > { %v559_v26 = vsel %vm557_vm4, %v552_v25, %v554_v24  ;;  %1899 = vmatprep.mubr.msk.f32.mxu1 %vm2032_vm0, %v2031_v3  ;;  %634 = vmatprep.mubr.f32.mxu0 %v2031_v3 }
  0x92   : > { %v556_v27 = vpop.permute.xlu1 %555  ;;  %1825 = vmatprep.subr.msk.mxu0 %vm228_vm1, %v559_v26 }
  0x93   : > { %v560_v28 = vsel %vm557_vm4, %v554_v24, %v556_v27 }
  0x94   : > { %v550_v29 = vpop.permute.xlu0 %549  ;;  %1898 = vmatpush3.msk.msra.mxu1 %vm228_vm1, %v560_v28 }
  0x95   : > { %v558_v31 = vsel %vm557_vm4, %v550_v29, %v552_v25  ;;  %1902 = vmatprep.subr.mxu1 %v2031_v3 }
  0x96   : > { %1826 = vmatpush1.msk.msra.mxu0 %vm228_vm1, %v558_v31  ;;  %v721_v32 = vpop.permute.xlu1 %720 }
  0x97   : > { %1900 = vmatmul.mubr.msk.f32.vlgmr.msra.gmra.mrb[0].mxu1 %vm224_vm2, %v1824_v30 }
  0x98   : > { %v719_v33 = vpop.permute.xlu0 %718  ;;  %1827 = vmatmul.mubr.msk.f32.vlgmr.msra.gmra.mrb[0].mxu0 %vm224_vm2, %v1824_v30  ;;  %1904 = vmatprep.mubr.msk.f32.mxu1 %vm2032_vm0, %v2031_v3 }
  0x99   : > { %v726_v34 = vsel %vm724_vm5, %v719_v33, %v721_v32  ;;  %801 = vmatprep.mubr.f32.mxu0 %v2031_v3 }
  0x9a   : > { %v723_v35 = vpop.permute.xlu1 %722  ;;  %1831 = vmatprep.subr.msk.mxu0 %vm228_vm1, %v726_v34 }
  0x9b   : > { %v727_v36 = vsel %vm724_vm5, %v721_v32, %v723_v35 }
  0x9c   : > { %v717_v37 = vpop.permute.xlu0 %716  ;;  %1903 = vmatpush3.msk.msra.mxu1 %vm228_vm1, %v727_v36 }
  0x9d   : > { %v725_v39 = vsel %vm724_vm5, %v717_v37, %v719_v33  ;;  %1907 = vmatprep.subr.mxu1 %v2031_v3 }
  0x9e   : > { %1832 = vmatpush1.msk.msra.mxu0 %vm228_vm1, %v725_v39  ;;  %v888_v40 = vpop.permute.xlu1 %887 }
  0x9f   : > { %1905 = vmatmul.mubr.msk.f32.vlgmr.msra.gmra.mrb[0].mxu1 %vm224_vm2, %v1830_v38 }
  0xa0   : > { %v886_v41 = vpop.permute.xlu0 %885  ;;  %1833 = vmatmul.mubr.msk.f32.vlgmr.msra.gmra.mrb[0].mxu0 %vm224_vm2, %v1830_v38  ;;  %1909 = vmatprep.mubr.msk.f32.mxu1 %vm2032_vm0, %v2031_v3 }
  0xa1   : > { %v893_v42 = vsel %vm891_vm6, %v886_v41, %v888_v40  ;;  %968 = vmatprep.mubr.f32.mxu0 %v2031_v3 }
  0xa2   : > { %v890_v43 = vpop.permute.xlu1 %889  ;;  %1837 = vmatprep.subr.msk.mxu0 %vm228_vm1, %v893_v42 }
  0xa3   : > { %v894_v44 = vsel %vm891_vm6, %v888_v40, %v890_v43 }
  0xa4   : > { %v884_v45 = vpop.permute.xlu0 %883  ;;  %1908 = vmatpush3.msk.msra.mxu1 %vm228_vm1, %v894_v44 }
  0xa5   : > { %v892_v47 = vsel %vm891_vm6, %v884_v45, %v886_v41  ;;  %1912 = vmatprep.subr.mxu1 %v2031_v3 }
  0xa6   : > { %1838 = vmatpush1.msk.msra.mxu0 %vm228_vm1, %v892_v47  ;;  %v1055_v48 = vpop.permute.xlu1 %1054 }
  0xa7   : > { %1910 = vmatmul.mubr.msk.f32.vlgmr.msra.gmra.mrb[0].mxu1 %vm224_vm2, %v1836_v46 }
  0xa8   : > { %v1053_v49 = vpop.permute.xlu0 %1052  ;;  %1839 = vmatmul.mubr.msk.f32.vlgmr.msra.gmra.mrb[0].mxu0 %vm224_vm2, %v1836_v46  ;;  %1914 = vmatprep.mubr.msk.f32.mxu1 %vm2032_vm0, %v2031_v3 }
  0xa9   : > { %v1060_v50 = vsel %vm1058_vm7, %v1053_v49, %v1055_v48  ;;  %1135 = vmatprep.mubr.f32.mxu0 %v2031_v3 }
  0xaa   : > { %v1057_v51 = vpop.permute.xlu1 %1056  ;;  %1843 = vmatprep.subr.msk.mxu0 %vm228_vm1, %v1060_v50 }
  0xab   : > { %v1061_v52 = vsel %vm1058_vm7, %v1055_v48, %v1057_v51 }
  0xac   : > { %v1051_v53 = vpop.permute.xlu0 %1050  ;;  %1913 = vmatpush3.msk.msra.mxu1 %vm228_vm1, %v1061_v52 }
  0xad   : > { %v1059_v55 = vsel %vm1058_vm7, %v1051_v53, %v1053_v49  ;;  %1917 = vmatprep.subr.mxu1 %v2031_v3 }
  0xae   : > { %1844 = vmatpush1.msk.msra.mxu0 %vm228_vm1, %v1059_v55  ;;  %v1222_v56 = vpop.permute.xlu1 %1221 }
  0xaf   : > { %1915 = vmatmul.mubr.msk.f32.vlgmr.msra.gmra.mrb[0].mxu1 %vm224_vm2, %v1842_v54 }
  0xb0   : > { %v1220_v57 = vpop.permute.xlu0 %1219  ;;  %1845 = vmatmul.mubr.msk.f32.vlgmr.msra.gmra.mrb[0].mxu0 %vm224_vm2, %v1842_v54  ;;  %1919 = vmatprep.mubr.msk.f32.mxu1 %vm2032_vm0, %v2031_v3 }
  0xb1   : > { %v1227_v58 = vsel %vm1225_vm8, %v1220_v57, %v1222_v56  ;;  %1302 = vmatprep.mubr.f32.mxu0 %v2031_v3 }
  0xb2   : > { %v1224_v59 = vpop.permute.xlu1 %1223  ;;  %1849 = vmatprep.subr.msk.mxu0 %vm228_vm1, %v1227_v58 }
  0xb3   : > { %v1228_v60 = vsel %vm1225_vm8, %v1222_v56, %v1224_v59 }
  0xb4   : > { %v1218_v61 = vpop.permute.xlu0 %1217  ;;  %1918 = vmatpush3.msk.msra.mxu1 %vm228_vm1, %v1228_v60 }
  0xb5   : > { %v1226_v63 = vsel %vm1225_vm8, %v1218_v61, %v1220_v57  ;;  %1922 = vmatprep.subr.mxu1 %v2031_v3 }
  0xb6   : > { %1850 = vmatpush1.msk.msra.mxu0 %vm228_vm1, %v1226_v63  ;;  %v1389_v0 = vpop.permute.xlu1 %1388 }
  0xb7   : > { %1920 = vmatmul.mubr.msk.f32.vlgmr.msra.gmra.mrb[0].mxu1 %vm224_vm2, %v1848_v62 }
  0xb8   : > { %v1387_v1 = vpop.permute.xlu0 %1386  ;;  %1851 = vmatmul.mubr.msk.f32.vlgmr.msra.gmra.mrb[0].mxu0 %vm224_vm2, %v1848_v62  ;;  %1924 = vmatprep.mubr.msk.f32.mxu1 %vm2032_vm0, %v2031_v3 }
  0xb9   : > { %v1394_v2 = vsel %vm1392_vm9, %v1387_v1, %v1389_v0  ;;  %1469 = vmatprep.mubr.f32.mxu0 %v2031_v3 }
  0xba   : > { %v1391_v4 = vpop.permute.xlu1 %1390  ;;  %1855 = vmatprep.subr.msk.mxu0 %vm228_vm1, %v1394_v2 }
  0xbb   : > { %v1395_v5 = vsel %vm1392_vm9, %v1389_v0, %v1391_v4 }
  0xbc   : > { %v1385_v6 = vpop.permute.xlu0 %1384  ;;  %1923 = vmatpush3.msk.msra.mxu1 %vm228_vm1, %v1395_v5 }
  0xbd   : > { %v1393_v8 = vsel %vm1392_vm9, %v1385_v6, %v1387_v1  ;;  %1927 = vmatprep.subr.mxu1 %v2031_v3 }
  0xbe   : > { %1856 = vmatpush1.msk.msra.mxu0 %vm228_vm1, %v1393_v8  ;;  %v1556_v9 = vpop.permute.xlu1 %1555 }
  0xbf   : > { %1925 = vmatmul.mubr.msk.f32.vlgmr.msra.gmra.mrb[0].mxu1 %vm224_vm2, %v1854_v7 }
  0xc0   : > { %v1554_v10 = vpop.permute.xlu0 %1553  ;;  %1857 = vmatmul.mubr.msk.f32.vlgmr.msra.gmra.mrb[0].mxu0 %vm224_vm2, %v1854_v7  ;;  %1929 = vmatprep.mubr.msk.f32.mxu1 %vm2032_vm0, %v2031_v3 }
  0xc1   : > { %v1561_v11 = vsel %vm1559_vm10, %v1554_v10, %v1556_v9  ;;  %1636 = vmatprep.mubr.f32.mxu0 %v2031_v3 }
  0xc2   : > { %v1558_v12 = vpop.permute.xlu1 %1557  ;;  %1861 = vmatprep.subr.msk.mxu0 %vm228_vm1, %v1561_v11 }
  0xc3   : > { %v1562_v13 = vsel %vm1559_vm10, %v1556_v9, %v1558_v12 }
  0xc4   : > { %v1552_v14 = vpop.permute.xlu0 %1551  ;;  %1928 = vmatpush3.msk.msra.mxu1 %vm228_vm1, %v1562_v13 }
  0xc5   : > { %v1560_v16 = vsel %vm1559_vm10, %v1552_v14, %v1554_v10 }
  0xc6   : > { %1862 = vmatpush1.msk.msra.mxu0 %vm228_vm1, %v1560_v16 }
  0xc7   : > { %1930 = vmatmul.mubr.msk.f32.vlgmr.msra.gmra.mrb[0].mxu1 %vm224_vm2, %v1860_v15 }
  0xc8   : > { %1863 = vmatmul.mubr.msk.f32.vlgmr.msra.gmra.mrb[0].mxu0 %vm224_vm2, %v1860_v15 }
  0xd5   : > { %v199_v17 = vpop.permute.xlu0 %198 }
 0x19a   : > { %v1709_v3 = vpop.f32.mrb[0].mxu1 }
 0x19b   : > { %v1934_v18 = vadd.f32 %v1709_v3, %v199_v17  ;;  %v1638_v19 = vpop.f32.mrb[0].mxu0  ;;  %v1931_v20 = vpop.f32.mrb[1].mxu1 }
 0x19c   : > { %v1932_v21 = vadd.f32 %v1638_v19, %v199_v17  ;;  %v1640_v22 = vpop.f32.mrb[1].mxu0 }
 0x19d   : > { %v1718_v23 = vmax.f32 %v1934_v18, 0.0  ;;  %v1933_v24 = vadd.f32 %v1640_v22, %v199_v17 }
 0x19e   : > { %v1716_v25 = vmax.f32 %v1932_v21, 0.0 }
 0x19f   : > { %1721 = vst [vmem:[%s192_s28 + $0x10] sm:$0xff] %v1718_v23  ;;  %v1717_v26 = vmax.f32 %v1933_v24, 0.0 }
 0x1a0   : > { %1719 = vst [vmem:[%s192_s28] sm:$0xff] %v1716_v25 }
 0x1a1   : > { %1720 = vst [vmem:[%s192_s28 + $0x8] sm:$0xff] %v1717_v26 }
 0x1a2 PF: > { %s13_s14 = sadd.s32 1, %s2028_s14   ;;  %s2214_s12 = smov %s2024_s13 }
 0x1a3   : > { %p10_p5 = scmp.ge.s32.totalorder %s13_s14, 10   ;;  %s2215_s13 = smov %s2217_s15 }
 0x1a5   :  { %12 = sbr.rel (!%p10_p5) target bundleno = 2 (0x2), region = 71 }

// kernel: _lambda_.6
= control target key start
LH: loop header
LB: loop body
LE: loop exit
PB: predicated region body
PF: predicated region fallthrough
CT: control target
= control target key end

     0   :  { %s1350_s12 = smov 0   ;;  %s1352_s13 = smov 0   ;;  %s1468_s0 = inlined_call_operand.vmem [shape: f32[9,16,8], index: 0, kind: input, shape index: {}]   ;;  %s1469_s1 = inlined_call_operand.vmem [shape: f32[16,1], index: 1, kind: input, shape index: {}]   ;;  %s1470_s2 = inlined_call_operand.vmem [shape: f32[8,8,150], index: 2, kind: input, shape index: {}]   ;;  %s1471_s3 = inlined_call_operand.vmem [shape: f32[8,16,128], index: 3, kind: output, shape index: {}]  }
   0x1   :  { %s1354_s14 = smov 0  }
   0x2 LB: > { %s25_s15 = sadd.s32 1, %s1315_s13  ;;  %p1129_p0 = scmp.ge.s32.totalorder %s1319_s14, 1  ;;  %s1319_s14 = sphi %s1354_s14, %s13_s14   ;;  %s1315_s13 = sphi %s1352_s13, %s1473_s13   ;;  %s1311_s12 = sphi %s1350_s12, %s1472_s12  }
   0x3   : > { %p27_p1 = scmp.ge.s32.totalorder %s25_s15, 8  ;;  %p151_p2 = scmp.lt.s32.totalorder %s1319_s14, 9 }
   0x5   : > { %s1475_s15 = smov (%p27_p1, %s25_s15), 0  ;;  %p152_p3 = pnand %p1129_p0, %p151_p2 }
   0x6   : > { %p178_p4 = scmp.lt.s32.totalorder (!%p152_p3), %s1311_s12, 7  ;;  %v210_v0 = vld [vmem:[%s1468_s0] sm:$0xff] (!%p152_p3)  ;;  %vm212_vm0 = vcmask (!%p152_p3), 64512   ;;  %s1321_s24 = smov (!%p152_p3), 116   ;;  %v211_v3 = vld [vmem:[%s1468_s0 + $0x8] sm:$0xff] (!%p152_p3)  ;;  %v1136_v5 = vld [vmem:[%s1468_s0 + $0x10] sm:$0xff] (!%p152_p3) }
   0x7   : > { %155 = sbr.rel (%p152_p3) target bundleno = 390 (0x186), region = 32  ;;  %1201 = vmatprep.mubr.msk.f32.mxu1 (!%p152_p3), %vm212_vm0, %v210_v0  ;;  %v1148_v1 = vld [vmem:[%s1468_s0 + $0x40] sm:$0xff] (!%p152_p3)  ;;  %s1322_s25 = smov (!%p152_p3), 117   ;;  %v1328_v6 = vmov (!%p152_p3), 0   ;;  %v193_v7 = vld [vmem:[%s1469_s1 + $0x8] sm:$0xff] (!%p152_p3)  ;;  %vm584_vm1 = vcmask (!%p152_p3), 957440  }
   0x8   : > { %1221 = vmatprep.mubr.msk.f32.mxu0 (!%p152_p3), %vm212_vm0, %v1148_v1  ;;  %s1323_s30 = smov (!%p152_p3), 127   ;;  %s1324_s4 = smov (!%p152_p3), 108   ;;  %1296 = vset.pattern.permute.xlu1 (!%p152_p3), %v1328_v6  ;;  %v192_v8 = vld [vmem:[%s1469_s1] sm:$0xff] (!%p152_p3)  ;;  %vm677_vm2 = vcmask (!%p152_p3), 949248   ;;  %v1149_v14 = vld [vmem:[%s1468_s0 + $0x48] sm:$0xff] (!%p152_p3)  ;;  %vm305_vm3 = vcmask (!%p152_p3), 1039360  }
   0x9   : > { %s1325_s5 = smov (!%p152_p3), 126   ;;  %s1326_s6 = smov (!%p152_p3), 107   ;;  %1295 = vset.pattern.permute.xlu0 (!%p152_p3), %v1328_v6  ;;  %v1152_v16 = vld [vmem:[%s1468_s0 + $0x50] sm:$0xff] (!%p152_p3)  ;;  %v1137_v20 = vld [vmem:[%s1468_s0 + $0x18] sm:$0xff] (!%p152_p3)  ;;  %vm770_vm4 = vcmask (!%p152_p3), 883712   ;;  %v1140_v21 = vld [vmem:[%s1468_s0 + $0x20] sm:$0xff] (!%p152_p3) }
   0xa   : > { %s1327_s7 = smov (!%p152_p3), 118   ;;  %s1329_s8 = smov (!%p152_p3), 106   ;;  %v1153_v25 = vld [vmem:[%s1468_s0 + $0x58] sm:$0xff] (!%p152_p3)  ;;  %vm398_vm5 = vcmask (!%p152_p3), 1031168   ;;  %v1156_v26 = vld [vmem:[%s1468_s0 + $0x60] sm:$0xff] (!%p152_p3)  ;;  %v1141_v30 = vld [vmem:[%s1468_s0 + $0x28] sm:$0xff] (!%p152_p3) }
   0xb   : > { %vm863_vm6 = vcmask (!%p152_p3), 875520   ;;  %v1144_v31 = vld [vmem:[%s1468_s0 + $0x30] sm:$0xff] (!%p152_p3)  ;;  %v1157_v35 = vld [vmem:[%s1468_s0 + $0x68] sm:$0xff] (!%p152_p3)  ;;  %vm491_vm7 = vcmask (!%p152_p3), 965632   ;;  %v1145_v40 = vld [vmem:[%s1468_s0 + $0x38] sm:$0xff] (!%p152_p3)  ;;  %vm956_vm8 = vcmask (!%p152_p3), 867328  }
   0xc   : > { %v1160_v36 = vld [vmem:[%s1468_s0 + $0x70] sm:$0xff] (!%p152_p3)  ;;  %v1161_v44 = vld [vmem:[%s1468_s0 + $0x78] sm:$0xff] (!%p152_p3)  ;;  %v1164_v45 = vld [vmem:[%s1468_s0 + $0x80] sm:$0xff] (!%p152_p3) }
   0xd   : > { %v1165_v46 = vld [vmem:[%s1468_s0 + $0x88] sm:$0xff] (!%p152_p3) }
   0xe   : > { %s1477_s12 = smov (!%p178_p4, %s1311_s12), 7 }
   0xf   : > { %s1170_s20 = sshll.u32 %s1477_s12, 4 }
  0x10   : > { %s182_s23 = scalar_lea.vmem %s1470_s2, %s1170_s20  ;;  %s190_s26 = scalar_lea.vmem %s1471_s3, %s1170_s20 }
  0x11   : > { %v208_v2 = vld [vmem:[%s182_s23] sm:$0xff]  ;;  %v209_v4 = vld [vmem:[%s182_s23 + $0x8] sm:$0xff] }
  0x12   : > { %673 = vrot.lane.b32.xlu1 %v208_v2, %s1321_s24  ;;  %580 = vrot.lane.b32.xlu0 %v208_v2, %s1322_s25 }
  0x13   : > { %1199 = vmatprep.subr.mxu1 %v208_v2 }
  0x14   : > { %1200 = vmatpush3.msra.mxu1 %v208_v2 }
  0x15   : > { %1202 = vmatmul.mubr.msk.f32.vlgmr.msra.gmra.mrb[0].mxu1 %vm212_vm0, %v211_v3 }
  0x16   : > { %675 = vrot.lane.b32.xlu1 %v209_v4, %s1321_s24  ;;  %582 = vrot.lane.b32.xlu0 %v209_v4, %s1322_s25 }
  0x17   : > { %1206 = vmatprep.mubr.msk.f32.mxu1 %vm212_vm0, %v1136_v5 }
  0x1a   : > { %303 = vrot.lane.b32.xlu1 %v209_v4, %s1323_s30  ;;  %301 = vrot.lane.b32.xlu0 %v208_v2, %s1323_s30 }
  0x1e   : > { %768 = vrot.lane.b32.xlu1 %v209_v4, %s1324_s4  ;;  %766 = vrot.lane.b32.xlu0 %v208_v2, %s1324_s4 }
  0x22   : > { %396 = vrot.lane.b32.xlu1 %v209_v4, %s1325_s5  ;;  %394 = vrot.lane.b32.xlu0 %v208_v2, %s1325_s5 }
  0x26   : > { %861 = vrot.lane.b32.xlu1 %v209_v4, %s1326_s6  ;;  %859 = vrot.lane.b32.xlu0 %v208_v2, %s1326_s6 }
  0x2a   : > { %489 = vrot.lane.b32.xlu1 %v209_v4, %s1327_s7  ;;  %487 = vrot.lane.b32.xlu0 %v208_v2, %s1327_s7 }
  0x2e   : > { %954 = vrot.lane.b32.xlu1 %v209_v4, %s1329_s8  ;;  %952 = vrot.lane.b32.xlu0 %v208_v2, %s1329_s8 }
  0x32   : > { %201 = vperm.xlu1 %1296, %v193_v7   ;;  %196 = vperm.xlu0 %1295, %v192_v8  }
  0x84   : > { %v674_v9 = vpop.permute.xlu1 %673  ;;  %v581_v10 = vpop.permute.xlu0 %580 }
  0x88   : > { %v676_v11 = vpop.permute.xlu1 %675  ;;  %v583_v12 = vpop.permute.xlu0 %582 }
  0x89   : > { %v585_v13 = vsel %vm584_vm1, %v581_v10, %v583_v12  ;;  %v678_v15 = vsel %vm677_vm2, %v674_v9, %v676_v11 }
  0x8a   : > { %1219 = vmatprep.subr.mxu0 %v585_v13 }
  0x8b   : > { %1220 = vmatpush3.msra.mxu0 %v585_v13 }
  0x8c   : > { %v304_v17 = vpop.permute.xlu1 %303  ;;  %1222 = vmatmul.mubr.msk.f32.vlgmr.msra.gmra.mrb[0].mxu0 %vm212_vm0, %v1149_v14  ;;  %1224 = vmatprep.subr.mxu0 %v678_v15  ;;  %v302_v18 = vpop.permute.xlu0 %301 }
  0x8d   : > { %1225 = vmatpush3.msra.mxu0 %v678_v15  ;;  %v306_v19 = vsel %vm305_vm3, %v302_v18, %v304_v17  ;;  %1226 = vmatprep.mubr.msk.f32.mxu0 %vm212_vm0, %v1152_v16 }
  0x8e   : > { %1204 = vmatprep.subr.mxu1 %v306_v19 }
  0x8f   : > { %1205 = vmatpush3.msra.mxu1 %v306_v19 }
  0x90   : > { %v769_v22 = vpop.permute.xlu1 %768  ;;  %v767_v23 = vpop.permute.xlu0 %766  ;;  %1207 = vmatmul.mubr.msk.f32.vlgmr.msra.gmra.mrb[0].mxu1 %vm212_vm0, %v1137_v20 }
  0x91   : > { %v771_v24 = vsel %vm770_vm4, %v767_v23, %v769_v22  ;;  %1211 = vmatprep.mubr.msk.f32.mxu1 %vm212_vm0, %v1140_v21 }
  0x92   : > { %1229 = vmatprep.subr.mxu0 %v771_v24 }
  0x94   : > { %v397_v27 = vpop.permute.xlu1 %396  ;;  %1227 = vmatmul.mubr.msk.f32.vlgmr.msra.gmra.mrb[0].mxu0 %vm212_vm0, %v1153_v25  ;;  %v395_v28 = vpop.permute.xlu0 %394 }
  0x95   : > { %1230 = vmatpush3.msra.mxu0 %v771_v24  ;;  %v399_v29 = vsel %vm398_vm5, %v395_v28, %v397_v27  ;;  %1231 = vmatprep.mubr.msk.f32.mxu0 %vm212_vm0, %v1156_v26 }
  0x96   : > { %1209 = vmatprep.subr.mxu1 %v399_v29 }
  0x97   : > { %1210 = vmatpush3.msra.mxu1 %v399_v29 }
  0x98   : > { %v862_v32 = vpop.permute.xlu1 %861  ;;  %v860_v33 = vpop.permute.xlu0 %859  ;;  %1212 = vmatmul.mubr.msk.f32.vlgmr.msra.gmra.mrb[0].mxu1 %vm212_vm0, %v1141_v30 }
  0x99   : > { %v864_v34 = vsel %vm863_vm6, %v860_v33, %v862_v32  ;;  %1216 = vmatprep.mubr.msk.f32.mxu1 %vm212_vm0, %v1144_v31 }
  0x9a   : > { %1234 = vmatprep.subr.mxu0 %v864_v34 }
  0x9c   : > { %v490_v37 = vpop.permute.xlu1 %489  ;;  %1232 = vmatmul.mubr.msk.f32.vlgmr.msra.gmra.mrb[0].mxu0 %vm212_vm0, %v1157_v35  ;;  %v488_v38 = vpop.permute.xlu0 %487 }
  0x9d   : > { %1235 = vmatpush3.msra.mxu0 %v864_v34  ;;  %v492_v39 = vsel %vm491_vm7, %v488_v38, %v490_v37  ;;  %1236 = vmatprep.mubr.msk.f32.mxu0 %vm212_vm0, %v1160_v36 }
  0x9e   : > { %1214 = vmatprep.subr.mxu1 %v492_v39 }
  0x9f   : > { %1215 = vmatpush3.msra.mxu1 %v492_v39 }
  0xa0   : > { %1217 = vmatmul.mubr.msk.f32.vlgmr.msra.gmra.mrb[0].mxu1 %vm212_vm0, %v1145_v40  ;;  %v955_v41 = vpop.permute.xlu1 %954  ;;  %v953_v42 = vpop.permute.xlu0 %952 }
  0xa1   : > { %v957_v43 = vsel %vm956_vm8, %v953_v42, %v955_v41 }
  0xa2   : > { %1239 = vmatprep.subr.mxu0 %v957_v43 }
  0xa4   : > { %1237 = vmatmul.mubr.msk.f32.vlgmr.msra.gmra.mrb[0].mxu0 %vm212_vm0, %v1161_v44 }
  0xa5   : > { %1240 = vmatpush3.msra.mxu0 %v957_v43  ;;  %1241 = vmatprep.mubr.msk.f32.mxu0 %vm212_vm0, %v1164_v45 }
  0xac   : > { %1242 = vmatmul.mubr.msk.f32.vlgmr.msra.gmra.mrb[0].mxu0 %vm212_vm0, %v1165_v46 }
  0xb1   : > { %v202_v49 = vpop.permute.xlu1 %201  ;;  %v197_v50 = vpop.permute.xlu0 %196 }
 0x173   : > { %v1218_v47 = vpop.f32.mrb[0].mxu1 }
 0x174   : > { %v566_v48 = vpop.f32.mrb[1].mxu1  ;;  %v1244_v51 = vadd.f32 %v1218_v47, %v202_v49 }
 0x175   : > { %v1246_v52 = vadd.f32 %v566_v48, %v197_v50 }
 0x17f   : > { %v1243_v53 = vpop.f32.mrb[0].mxu0 }
 0x180   : > { %v1245_v54 = vadd.f32 %v1244_v51, %v1243_v53  ;;  %v1031_v55 = vpop.f32.mrb[1].mxu0 }
 0x181   : > { %v1247_v56 = vadd.f32 %v1246_v52, %v1031_v55 }
 0x182   : > { %v1043_v57 = vmax.f32 %v1245_v54, 0.0 }
 0x183   : > { %v1042_v58 = vmax.f32 %v1247_v56, 0.0 }
 0x184   : > { %1045 = vst [vmem:[%s190_s26 + $0x8] sm:$0xff] %v1043_v57 }
 0x185   : > { %1044 = vst [vmem:[%s190_s26] sm:$0xff] %v1042_v58 }
 0x186 PF: > { %s13_s14 = sadd.s32 1, %s1319_s14   ;;  %s1472_s12 = smov %s1315_s13 }
 0x187   : > { %p10_p5 = scmp.ge.s32.totalorder %s13_s14, 10   ;;  %s1473_s13 = smov %s1475_s15 }
 0x189   :  { %12 = sbr.rel (!%p10_p5) target bundleno = 2 (0x2), region = 71 }

// kernel: _lambda_.7
= control target key start
LH: loop header
LB: loop body
LE: loop exit
PB: predicated region body
PF: predicated region fallthrough
CT: control target
= control target key end

     0   :  { %s4051_s18 = smov 0   ;;  %s4053_s19 = smov 0   ;;  %s4436_s0 = inlined_call_operand.vmem [shape: f32[9,8,16], index: 0, kind: input, shape index: {}]   ;;  %s4437_s1 = inlined_call_operand.vmem [shape: f32[9,8,8], index: 1, kind: input, shape index: {}]   ;;  %s4438_s2 = inlined_call_operand.vmem [shape: f32[8,1], index: 2, kind: input, shape index: {}]   ;;  %s4439_s3 = inlined_call_operand.vmem [shape: f32[8,16,422], index: 3, kind: input, shape index: {}]   ;;  %s4440_s4 = inlined_call_operand.vmem [shape: f32[8,8,422], index: 4, kind: input, shape index: {}]   ;;  %s4441_s5 = inlined_call_operand.vmem [shape: f32[8,8,384], index: 5, kind: output, shape index: {}]  }
   0x1   :  { %s4055_s20 = smov 0  }
   0x2 LB: > { %s27_s21 = sadd.s32 1, %s4003_s19  ;;  %p3438_p0 = scmp.ge.s32.totalorder %s4007_s20, 1  ;;  %s4007_s20 = sphi %s4055_s20, %s15_s20   ;;  %s4003_s19 = sphi %s4053_s19, %s4443_s19   ;;  %s3999_s18 = sphi %s4051_s18, %s4442_s18  }
   0x3   : > { %p29_p1 = scmp.ge.s32.totalorder %s27_s21, 8  ;;  %p211_p2 = scmp.lt.s32.totalorder %s4007_s20, 9 }
   0x5   : > { %s4445_s21 = smov (%p29_p1, %s27_s21), 0  ;;  %p212_p3 = pnand %p3438_p0, %p211_p2 }
   0x6   : > { %p248_p4 = scmp.lt.s32.totalorder (!%p212_p3), %s3999_s18, 7  ;;  %v4009_v0 = vmov (!%p212_p3), 0.0|0.0   ;;  %vm4010_vm0 = vmmov (!%p212_p3), 0   ;;  %v4011_v1 = vmov (!%p212_p3), 0.0   ;;  %s4012_s26 = smov (!%p212_p3), 127   ;;  %v287_v17 = vld [vmem:[%s4436_s0] sm:$0xff] (!%p212_p3) }
   0x7   : > { %215 = sbr.rel (%p212_p3) target bundleno = 494 (0x1ee), region = 40  ;;  %3657 = vmatprep.subr.bf16.mxu1 (!%p212_p3), %v4009_v0  ;;  %3549 = vmatprep.mubr.msk.f32.mxu1 (!%p212_p3), %vm4010_vm0, %v4011_v1  ;;  %s4013_s27 = smov (!%p212_p3), 126   ;;  %vm288_vm1 = vcmask (!%p212_p3), 130048   ;;  %vm462_vm2 = vcmask (!%p212_p3), 1039360   ;;  %vm640_vm3 = vcmask (!%p212_p3), 1031168   ;;  %v3446_v49 = vld [vmem:[%s4436_s0 + $0x8] sm:$0xff] (!%p212_p3) }
   0x8   : > { %356 = vmatprep.mubr.f32.mxu0 (!%p212_p3), %v4011_v1  ;;  %s4014_s30 = smov (!%p212_p3), 110   ;;  %s4015_s6 = smov (!%p212_p3), 109   ;;  %v269_v59 = vld [vmem:[%s4438_s2] sm:$0xff] (!%p212_p3)  ;;  %vm818_vm4 = vcmask (!%p212_p3), 900096   ;;  %vm996_vm5 = vcmask (!%p212_p3), 891904   ;;  %vm1174_vm6 = vcmask (!%p212_p3), 883712  }
   0x9   : > { %s4016_s7 = smov (!%p212_p3), 108   ;;  %s4017_s8 = smov (!%p212_p3), 92   ;;  %vm1352_vm7 = vcmask (!%p212_p3), 752640   ;;  %vm1530_vm8 = vcmask (!%p212_p3), 744448   ;;  %vm1708_vm9 = vcmask (!%p212_p3), 736256   ;;  %vm1875_vm10 = vcmask (!%p212_p3), 64512  }
   0xa   : > { %s4018_s9 = smov (!%p212_p3), 91   ;;  %s4019_s11 = smov (!%p212_p3), 90  }
   0xe   : > { %s4447_s18 = smov (!%p248_p4, %s3999_s18), 7 }
   0xf   : > { %s3498_s22 = sshll.u32 %s4447_s18, 6  ;;  %s3499_s10 = sshll.u32 %s4447_s18, 5 }
  0x10   : > { %s252_s25 = scalar_lea.vmem %s4439_s3, %s3498_s22  ;;  %s257_s14 = scalar_lea.vmem %s4440_s4, %s3499_s10 }
  0x11   : > { %v280_v2 = vld [vmem:[%s252_s25 + $0x8] sm:$0xff]  ;;  %v281_v3 = vld [vmem:[%s252_s25 + $0x10] sm:$0xff]  ;;  %v279_v4 = vld [vmem:[%s252_s25] sm:$0xff] }
  0x12   : > { %v3824_v5 = vpack.i.bf16 %v281_v3, %v280_v2  ;;  %v283_v6 = vld [vmem:[%s252_s25 + $0x20] sm:$0xff]  ;;  %v284_v7 = vld [vmem:[%s252_s25 + $0x28] sm:$0xff]  ;;  %v285_v8 = vld [vmem:[%s252_s25 + $0x30] sm:$0xff] }
  0x13   : > { %v3834_v9 = vpack.i.bf16 %v283_v6, %v279_v4  ;;  %v282_v10 = vld [vmem:[%s252_s25 + $0x18] sm:$0xff]  ;;  %v3829_v12 = vpack.i.bf16 %v285_v8, %v284_v7  ;;  %v3653_v14 = vpack.c.bf16 %v284_v7, %v280_v2  ;;  %v3658_v15 = vpack.c.bf16 %v285_v8, %v281_v3  ;;  %v4124_v18 = vld [vmem:[%s257_s14 + $0x8] sm:$0xff]  ;;  %v4126_v19 = vld [vmem:[%s257_s14 + $0x10] sm:$0xff] }
  0x14   : > { %v286_v11 = vld [vmem:[%s252_s25 + $0x38] sm:$0xff]  ;;  %3825 = vrot.lane.b32.xlu0 %v3824_v5, %s4012_s26  ;;  %v3655_v16 = vpack.c.bf16 %v283_v6, %v279_v4  ;;  %v4132_v20 = vld [vmem:[%s257_s14] sm:$0xff]  ;;  %v4020_v4 = vmov 0  }
  0x15   : > { %3835 = vrot.lane.b32.xlu1 %v3834_v9, %s4012_s26  ;;  %v3839_v13 = vpack.i.bf16 %v286_v11, %v282_v10  ;;  %3654 = vmatprep.subr.bf16.mxu0 %v3653_v14  ;;  %v4134_v21 = vld [vmem:[%s257_s14 + $0x18] sm:$0xff]  ;;  %v3449_v11 = vld [vmem:[%s4436_s0 + $0x10] sm:$0xff] }
  0x16   : > { %3659 = vmatpush3.bf16.msra.mxu1 %v3658_v15  ;;  %3656 = vmatpush1.bf16.msra.mxu0 %v3655_v16 }
  0x17   : > { %3664 = vmatprep.subr.bf16.mxu1 %v4009_v0  ;;  %3984 = vset.pattern.permute.xlu0 %v4020_v4 }
  0x18   : > { %3830 = vrot.lane.b32.xlu0 %v3829_v12, %s4012_s26 }
  0x19   : > { %3840 = vrot.lane.b32.xlu1 %v3839_v13, %s4012_s26  ;;  %3550 = vmatmul.mubr.msk.f32.vlgmr.msra.gmra.mrb[0].mxu1 %vm288_vm1, %v287_v17 }
  0x1a   : > { %3444 = vmatmul.mubr.msk.f32.vlgmr.msra.gmra.mrb[0].mxu0 %vm288_vm1, %v287_v17  ;;  %3556 = vmatprep.mubr.msk.f32.mxu1 %vm4010_vm0, %v4011_v1 }
  0x1b   : > { %542 = vmatprep.mubr.f32.mxu0 %v4011_v1 }
  0x1c   : > { %3845 = vrot.lane.b32.xlu0 %v3824_v5, %s4013_s27 }
  0x1d   : > { %3850 = vrot.lane.b32.xlu1 %v3829_v12, %s4013_s27 }
  0x20   : > { %3855 = vrot.lane.b32.xlu0 %v3834_v9, %s4013_s27 }
  0x21   : > { %3860 = vrot.lane.b32.xlu1 %v3839_v13, %s4013_s27 }
  0x24   : > { %3865 = vrot.lane.b32.xlu0 %v3824_v5, %s4014_s30 }
  0x25   : > { %3870 = vrot.lane.b32.xlu1 %v3829_v12, %s4014_s30 }
  0x28   : > { %3875 = vrot.lane.b32.xlu0 %v3834_v9, %s4014_s30 }
  0x29   : > { %3880 = vrot.lane.b32.xlu1 %v3839_v13, %s4014_s30 }
  0x2c   : > { %3885 = vrot.lane.b32.xlu0 %v3824_v5, %s4015_s6 }
  0x2d   : > { %3890 = vrot.lane.b32.xlu1 %v3829_v12, %s4015_s6 }
  0x30   : > { %3895 = vrot.lane.b32.xlu0 %v3834_v9, %s4015_s6 }
  0x31   : > { %3900 = vrot.lane.b32.xlu1 %v3839_v13, %s4015_s6 }
  0x34   : > { %3905 = vrot.lane.b32.xlu0 %v3824_v5, %s4016_s7 }
  0x35   : > { %3910 = vrot.lane.b32.xlu1 %v3829_v12, %s4016_s7 }
  0x38   : > { %3915 = vrot.lane.b32.xlu0 %v3834_v9, %s4016_s7 }
  0x39   : > { %3920 = vrot.lane.b32.xlu1 %v3839_v13, %s4016_s7 }
  0x3c   : > { %3925 = vrot.lane.b32.xlu0 %v3824_v5, %s4017_s8 }
  0x3d   : > { %3930 = vrot.lane.b32.xlu1 %v3829_v12, %s4017_s8 }
  0x40   : > { %3935 = vrot.lane.b32.xlu0 %v3834_v9, %s4017_s8 }
  0x41   : > { %3940 = vrot.lane.b32.xlu1 %v3839_v13, %s4017_s8 }
  0x44   : > { %3945 = vrot.lane.b32.xlu0 %v3824_v5, %s4018_s9 }
  0x45   : > { %3950 = vrot.lane.b32.xlu1 %v3829_v12, %s4018_s9 }
  0x48   : > { %3955 = vrot.lane.b32.xlu0 %v3834_v9, %s4018_s9 }
  0x49   : > { %3960 = vrot.lane.b32.xlu1 %v3839_v13, %s4018_s9 }
  0x4c   : > { %3965 = vrot.lane.b32.xlu0 %v3824_v5, %s4019_s11 }
  0x4d   : > { %3970 = vrot.lane.b32.xlu1 %v3829_v12, %s4019_s11 }
  0x50   : > { %3975 = vrot.lane.b32.xlu0 %v3834_v9, %s4019_s11 }
  0x51   : > { %3980 = vrot.lane.b32.xlu1 %v3839_v13, %s4019_s11 }
  0x54   : > { %2031 = vrot.lane.b32.xlu0 %v4124_v18, %s4012_s26 }
  0x55   : > { %2033 = vrot.lane.b32.xlu1 %v4126_v19, %s4012_s26 }
  0x58   : > { %2029 = vrot.lane.b32.xlu0 %v4132_v20, %s4012_s26 }
  0x59   : > { %2035 = vrot.lane.b32.xlu1 %v4134_v21, %s4012_s26 }
  0x5c   : > { %2194 = vrot.lane.b32.xlu0 %v4124_v18, %s4013_s27 }
  0x5d   : > { %2196 = vrot.lane.b32.xlu1 %v4126_v19, %s4013_s27 }
  0x60   : > { %2192 = vrot.lane.b32.xlu0 %v4132_v20, %s4013_s27 }
  0x61   : > { %2198 = vrot.lane.b32.xlu1 %v4134_v21, %s4013_s27 }
  0x64   : > { %2357 = vrot.lane.b32.xlu0 %v4124_v18, %s4014_s30 }
  0x65   : > { %2359 = vrot.lane.b32.xlu1 %v4126_v19, %s4014_s30 }
  0x68   : > { %2355 = vrot.lane.b32.xlu0 %v4132_v20, %s4014_s30 }
  0x69   : > { %2361 = vrot.lane.b32.xlu1 %v4134_v21, %s4014_s30 }
  0x6c   : > { %2520 = vrot.lane.b32.xlu0 %v4124_v18, %s4015_s6 }
  0x6d   : > { %2522 = vrot.lane.b32.xlu1 %v4126_v19, %s4015_s6 }
  0x70   : > { %2518 = vrot.lane.b32.xlu0 %v4132_v20, %s4015_s6 }
  0x71   : > { %2524 = vrot.lane.b32.xlu1 %v4134_v21, %s4015_s6 }
  0x74   : > { %2683 = vrot.lane.b32.xlu0 %v4124_v18, %s4016_s7 }
  0x75   : > { %2685 = vrot.lane.b32.xlu1 %v4126_v19, %s4016_s7 }
  0x78   : > { %2681 = vrot.lane.b32.xlu0 %v4132_v20, %s4016_s7 }
  0x79   : > { %2687 = vrot.lane.b32.xlu1 %v4134_v21, %s4016_s7 }
  0x7c   : > { %2846 = vrot.lane.b32.xlu0 %v4124_v18, %s4017_s8 }
  0x7d   : > { %2848 = vrot.lane.b32.xlu1 %v4126_v19, %s4017_s8 }
  0x80   : > { %2844 = vrot.lane.b32.xlu0 %v4132_v20, %s4017_s8 }
  0x81   : > { %2850 = vrot.lane.b32.xlu1 %v4134_v21, %s4017_s8 }
  0x84   : > { %3009 = vrot.lane.b32.xlu0 %v4124_v18, %s4018_s9 }
  0x85   : > { %3011 = vrot.lane.b32.xlu1 %v4126_v19, %s4018_s9 }
  0x86   : > { %v3826_v22 = vpop.permute.xlu0 %3825 }
  0x87   : > { %v3836_v23 = vpop.permute.xlu1 %3835  ;;  %v3828_v24 = vunpack.i.h.bf16 %v3826_v22  ;;  %v3827_v25 = vunpack.i.l.bf16 %v3826_v22 }
  0x88   : > { %3007 = vrot.lane.b32.xlu0 %v4132_v20, %s4018_s9  ;;  %v3837_v26 = vunpack.i.l.bf16 %v3836_v23  ;;  %v3838_v28 = vunpack.i.h.bf16 %v3836_v23 }
  0x89   : > { %3013 = vrot.lane.b32.xlu1 %v4134_v21, %s4018_s9  ;;  %v464_v36 = vsel %vm462_vm2, %v3827_v25, %v3828_v24  ;;  %s3787_s9 = smul.u32 24, %s4447_s18 }
  0x8a   : > { %v3831_v27 = vpop.permute.xlu0 %3830  ;;  %v463_v34 = vsel %vm462_vm2, %v3837_v26, %v3827_v25 }
  0x8b   : > { %v3833_v29 = vunpack.i.h.bf16 %v3831_v27  ;;  %v3832_v30 = vunpack.i.l.bf16 %v3831_v27  ;;  %v3841_v31 = vpop.permute.xlu1 %3840  ;;  %s266_s12 = scalar_lea.vmem %s4441_s5, %s3787_s9 }
  0x8c   : > { %v3843_v32 = vunpack.i.h.bf16 %v3841_v31  ;;  %v3842_v33 = vunpack.i.l.bf16 %v3841_v31  ;;  %3172 = vrot.lane.b32.xlu0 %v4124_v18, %s4019_s11 }
  0x8d   : > { %v466_v35 = vsel %vm462_vm2, %v3838_v28, %v3832_v30  ;;  %v467_v37 = vsel %vm462_vm2, %v3832_v30, %v3833_v29  ;;  %3174 = vrot.lane.b32.xlu1 %v4126_v19, %s4019_s11 }
  0x8e   : > { %v3662_v38 = vpack.c.bf16 %v466_v35, %v463_v34  ;;  %v468_v39 = vsel %vm462_vm2, %v3833_v29, %v3843_v32  ;;  %v465_v40 = vsel %vm462_vm2, %v3828_v24, %v3842_v33  ;;  %v3846_v41 = vpop.permute.xlu0 %3845  ;;  %v3660_v42 = vpack.c.bf16 %v467_v37, %v464_v36  ;;  %v3452_v36 = vld [vmem:[%s4436_s0 + $0x18] sm:$0xff] }
  0x8f   : > { %v3665_v43 = vpack.c.bf16 %v468_v39, %v465_v40  ;;  %v3848_v44 = vunpack.i.h.bf16 %v3846_v41  ;;  %v3847_v45 = vunpack.i.l.bf16 %v3846_v41  ;;  %v3851_v46 = vpop.permute.xlu1 %3850 }
  0x90   : > { %v3853_v47 = vunpack.i.h.bf16 %v3851_v46  ;;  %v3852_v48 = vunpack.i.l.bf16 %v3851_v46  ;;  %3661 = vmatprep.subr.bf16.mxu0 %v3660_v42  ;;  %3170 = vrot.lane.b32.xlu0 %v4132_v20, %s4019_s11 }
  0x91   : > { %3666 = vmatpush3.bf16.msra.mxu1 %v3665_v43  ;;  %3663 = vmatpush1.bf16.msra.mxu0 %v3662_v38  ;;  %v642_v50 = vsel %vm640_vm3, %v3847_v45, %v3848_v44 }
  0x92   : > { %v3856_v51 = vpop.permute.xlu0 %3855  ;;  %v645_v52 = vsel %vm640_vm3, %v3852_v48, %v3853_v47  ;;  %3671 = vmatprep.subr.bf16.mxu1 %v4009_v0  ;;  %3176 = vrot.lane.b32.xlu1 %v4134_v21, %s4019_s11 }
  0x93   : > { %v3858_v53 = vunpack.i.h.bf16 %v3856_v51  ;;  %v3857_v54 = vunpack.i.l.bf16 %v3856_v51  ;;  %v3861_v55 = vpop.permute.xlu1 %3860  ;;  %v3667_v56 = vpack.c.bf16 %v645_v52, %v642_v50 }
  0x94   : > { %v3863_v57 = vunpack.i.h.bf16 %v3861_v55  ;;  %v3862_v58 = vunpack.i.l.bf16 %v3861_v55  ;;  %3557 = vmatmul.mubr.msk.f32.vlgmr.msra.gmra.mrb[0].mxu1 %vm288_vm1, %v3446_v49  ;;  %3447 = vmatmul.mubr.msk.f32.vlgmr.msra.gmra.mrb[0].mxu0 %vm288_vm1, %v3446_v49 }
  0x95   : > { %v641_v60 = vsel %vm640_vm3, %v3857_v54, %v3847_v45  ;;  %v644_v61 = vsel %vm640_vm3, %v3858_v53, %v3852_v48  ;;  %3668 = vmatprep.subr.bf16.mxu0 %v3667_v56  ;;  %3563 = vmatprep.mubr.msk.f32.mxu1 %vm4010_vm0, %v4011_v1 }
  0x96   : > { %v3669_v62 = vpack.c.bf16 %v644_v61, %v641_v60  ;;  %v643_v63 = vsel %vm640_vm3, %v3848_v44, %v3862_v58  ;;  %v646_v2 = vsel %vm640_vm3, %v3853_v47, %v3863_v57  ;;  %v3866_v3 = vpop.permute.xlu0 %3865  ;;  %720 = vmatprep.mubr.f32.mxu0 %v4011_v1  ;;  %272 = vperm.xlu0 %3984, %v269_v59   ;;  %v3455_v58 = vld [vmem:[%s4436_s0 + $0x20] sm:$0xff] }
  0x97   : > { %v3672_v5 = vpack.c.bf16 %v646_v2, %v643_v63  ;;  %v3868_v6 = vunpack.i.h.bf16 %v3866_v3  ;;  %v3867_v7 = vunpack.i.l.bf16 %v3866_v3  ;;  %v3871_v8 = vpop.permute.xlu1 %3870 }
  0x98   : > { %v3873_v9 = vunpack.i.h.bf16 %v3871_v8  ;;  %v3872_v10 = vunpack.i.l.bf16 %v3871_v8  ;;  %3670 = vmatpush1.bf16.msra.mxu0 %v3669_v62 }
  0x99   : > { %3673 = vmatpush3.bf16.msra.mxu1 %v3672_v5  ;;  %v820_v12 = vsel %vm818_vm4, %v3867_v7, %v3868_v6 }
  0x9a   : > { %v3876_v13 = vpop.permute.xlu0 %3875  ;;  %v823_v14 = vsel %vm818_vm4, %v3872_v10, %v3873_v9  ;;  %3678 = vmatprep.subr.bf16.mxu1 %v4009_v0 }
  0x9b   : > { %v3878_v15 = vunpack.i.h.bf16 %v3876_v13  ;;  %v3877_v16 = vunpack.i.l.bf16 %v3876_v13  ;;  %v3881_v17 = vpop.permute.xlu1 %3880  ;;  %v3674_v21 = vpack.c.bf16 %v823_v14, %v820_v12 }
  0x9c   : > { %v3883_v22 = vunpack.i.h.bf16 %v3881_v17  ;;  %v3882_v23 = vunpack.i.l.bf16 %v3881_v17  ;;  %3564 = vmatmul.mubr.msk.f32.vlgmr.msra.gmra.mrb[0].mxu1 %vm288_vm1, %v3449_v11  ;;  %3450 = vmatmul.mubr.msk.f32.vlgmr.msra.gmra.mrb[0].mxu0 %vm288_vm1, %v3449_v11 }
  0x9d   : > { %v819_v24 = vsel %vm818_vm4, %v3877_v16, %v3867_v7  ;;  %v822_v25 = vsel %vm818_vm4, %v3878_v15, %v3872_v10  ;;  %3675 = vmatprep.subr.bf16.mxu0 %v3674_v21  ;;  %3570 = vmatprep.mubr.msk.f32.mxu1 %vm4010_vm0, %v4011_v1  ;;  %v3458_v21 = vld [vmem:[%s4436_s0 + $0x28] sm:$0xff] }
  0x9e   : > { %v3676_v26 = vpack.c.bf16 %v822_v25, %v819_v24  ;;  %v821_v27 = vsel %vm818_vm4, %v3868_v6, %v3882_v23  ;;  %v824_v28 = vsel %vm818_vm4, %v3873_v9, %v3883_v22  ;;  %v3886_v29 = vpop.permute.xlu0 %3885  ;;  %898 = vmatprep.mubr.f32.mxu0 %v4011_v1 }
  0x9f   : > { %v3679_v30 = vpack.c.bf16 %v824_v28, %v821_v27  ;;  %v3888_v31 = vunpack.i.h.bf16 %v3886_v29  ;;  %v3887_v32 = vunpack.i.l.bf16 %v3886_v29  ;;  %v3891_v33 = vpop.permute.xlu1 %3890 }
  0xa0   : > { %v3893_v34 = vunpack.i.h.bf16 %v3891_v33  ;;  %v3892_v35 = vunpack.i.l.bf16 %v3891_v33  ;;  %3677 = vmatpush1.bf16.msra.mxu0 %v3676_v26 }
  0xa1   : > { %3680 = vmatpush3.bf16.msra.mxu1 %v3679_v30  ;;  %v998_v37 = vsel %vm996_vm5, %v3887_v32, %v3888_v31 }
  0xa2   : > { %v3896_v38 = vpop.permute.xlu0 %3895  ;;  %v1001_v39 = vsel %vm996_vm5, %v3892_v35, %v3893_v34  ;;  %3685 = vmatprep.subr.bf16.mxu1 %v4009_v0 }
  0xa3   : > { %v3898_v40 = vunpack.i.h.bf16 %v3896_v38  ;;  %v3897_v41 = vunpack.i.l.bf16 %v3896_v38  ;;  %v3901_v42 = vpop.permute.xlu1 %3900  ;;  %v3681_v43 = vpack.c.bf16 %v1001_v39, %v998_v37 }
  0xa4   : > { %v3903_v44 = vunpack.i.h.bf16 %v3901_v42  ;;  %v3902_v45 = vunpack.i.l.bf16 %v3901_v42  ;;  %3571 = vmatmul.mubr.msk.f32.vlgmr.msra.gmra.mrb[0].mxu1 %vm288_vm1, %v3452_v36  ;;  %3453 = vmatmul.mubr.msk.f32.vlgmr.msra.gmra.mrb[0].mxu0 %vm288_vm1, %v3452_v36 }
  0xa5   : > { %v997_v46 = vsel %vm996_vm5, %v3897_v41, %v3887_v32  ;;  %v1000_v47 = vsel %vm996_vm5, %v3898_v40, %v3892_v35  ;;  %3682 = vmatprep.subr.bf16.mxu0 %v3681_v43  ;;  %3577 = vmatprep.mubr.msk.f32.mxu1 %vm4010_vm0, %v4011_v1  ;;  %v3461_v43 = vld [vmem:[%s4436_s0 + $0x30] sm:$0xff] }
  0xa6   : > { %v3683_v48 = vpack.c.bf16 %v1000_v47, %v997_v46  ;;  %v999_v49 = vsel %vm996_vm5, %v3888_v31, %v3902_v45  ;;  %v1002_v50 = vsel %vm996_vm5, %v3893_v34, %v3903_v44  ;;  %v3906_v51 = vpop.permute.xlu0 %3905  ;;  %1076 = vmatprep.mubr.f32.mxu0 %v4011_v1 }
  0xa7   : > { %v3686_v52 = vpack.c.bf16 %v1002_v50, %v999_v49  ;;  %v3908_v53 = vunpack.i.h.bf16 %v3906_v51  ;;  %v3907_v54 = vunpack.i.l.bf16 %v3906_v51  ;;  %v3911_v55 = vpop.permute.xlu1 %3910 }
  0xa8   : > { %v3913_v56 = vunpack.i.h.bf16 %v3911_v55  ;;  %v3912_v57 = vunpack.i.l.bf16 %v3911_v55  ;;  %3684 = vmatpush1.bf16.msra.mxu0 %v3683_v48 }
  0xa9   : > { %3687 = vmatpush3.bf16.msra.mxu1 %v3686_v52  ;;  %v1176_v59 = vsel %vm1174_vm6, %v3907_v54, %v3908_v53 }
  0xaa   : > { %v3916_v60 = vpop.permute.xlu0 %3915  ;;  %v1179_v61 = vsel %vm1174_vm6, %v3912_v57, %v3913_v56  ;;  %3692 = vmatprep.subr.bf16.mxu1 %v4009_v0 }
  0xab   : > { %v3918_v62 = vunpack.i.h.bf16 %v3916_v60  ;;  %v3917_v63 = vunpack.i.l.bf16 %v3916_v60  ;;  %v3921_v2 = vpop.permute.xlu1 %3920  ;;  %v3688_v3 = vpack.c.bf16 %v1179_v61, %v1176_v59 }
  0xac   : > { %v3923_v4 = vunpack.i.h.bf16 %v3921_v2  ;;  %v3922_v5 = vunpack.i.l.bf16 %v3921_v2  ;;  %3578 = vmatmul.mubr.msk.f32.vlgmr.msra.gmra.mrb[0].mxu1 %vm288_vm1, %v3455_v58  ;;  %3456 = vmatmul.mubr.msk.f32.vlgmr.msra.gmra.mrb[0].mxu0 %vm288_vm1, %v3455_v58 }
  0xad   : > { %v1175_v6 = vsel %vm1174_vm6, %v3917_v63, %v3907_v54  ;;  %v1178_v7 = vsel %vm1174_vm6, %v3918_v62, %v3912_v57  ;;  %3689 = vmatprep.subr.bf16.mxu0 %v3688_v3  ;;  %3584 = vmatprep.mubr.msk.f32.mxu1 %vm4010_vm0, %v4011_v1  ;;  %v3464_v3 = vld [vmem:[%s4436_s0 + $0x38] sm:$0xff] }
  0xae   : > { %v3690_v8 = vpack.c.bf16 %v1178_v7, %v1175_v6  ;;  %v1177_v9 = vsel %vm1174_vm6, %v3908_v53, %v3922_v5  ;;  %v1180_v10 = vsel %vm1174_vm6, %v3913_v56, %v3923_v4  ;;  %v3926_v11 = vpop.permute.xlu0 %3925  ;;  %1254 = vmatprep.mubr.f32.mxu0 %v4011_v1 }
  0xaf   : > { %v3693_v12 = vpack.c.bf16 %v1180_v10, %v1177_v9  ;;  %v3928_v13 = vunpack.i.h.bf16 %v3926_v11  ;;  %v3927_v14 = vunpack.i.l.bf16 %v3926_v11  ;;  %v3931_v15 = vpop.permute.xlu1 %3930 }
  0xb0   : > { %v3933_v16 = vunpack.i.h.bf16 %v3931_v15  ;;  %v3932_v17 = vunpack.i.l.bf16 %v3931_v15  ;;  %3691 = vmatpush1.bf16.msra.mxu0 %v3690_v8 }
  0xb1   : > { %3694 = vmatpush3.bf16.msra.mxu1 %v3693_v12  ;;  %v1354_v22 = vsel %vm1352_vm7, %v3927_v14, %v3928_v13 }
  0xb2   : > { %v3936_v23 = vpop.permute.xlu0 %3935  ;;  %v1357_v24 = vsel %vm1352_vm7, %v3932_v17, %v3933_v16  ;;  %3699 = vmatprep.subr.bf16.mxu1 %v4009_v0 }
  0xb3   : > { %v3938_v25 = vunpack.i.h.bf16 %v3936_v23  ;;  %v3937_v26 = vunpack.i.l.bf16 %v3936_v23  ;;  %v3941_v27 = vpop.permute.xlu1 %3940  ;;  %v3695_v28 = vpack.c.bf16 %v1357_v24, %v1354_v22  ;;  %v3467_v23 = vld [vmem:[%s4436_s0 + $0x40] sm:$0xff] }
  0xb4   : > { %v3943_v29 = vunpack.i.h.bf16 %v3941_v27  ;;  %v3942_v30 = vunpack.i.l.bf16 %v3941_v27  ;;  %3585 = vmatmul.mubr.msk.f32.vlgmr.msra.gmra.mrb[0].mxu1 %vm288_vm1, %v3458_v21  ;;  %3459 = vmatmul.mubr.msk.f32.vlgmr.msra.gmra.mrb[0].mxu0 %vm288_vm1, %v3458_v21 }
  0xb5   : > { %v1353_v31 = vsel %vm1352_vm7, %v3937_v26, %v3927_v14  ;;  %v1356_v32 = vsel %vm1352_vm7, %v3938_v25, %v3932_v17  ;;  %3696 = vmatprep.subr.bf16.mxu0 %v3695_v28  ;;  %3591 = vmatprep.mubr.msk.f32.mxu1 %vm4010_vm0, %v4011_v1  ;;  %v1874_v28 = vld [vmem:[%s4437_s1] sm:$0xff] }
  0xb6   : > { %v3697_v33 = vpack.c.bf16 %v1356_v32, %v1353_v31  ;;  %v1355_v34 = vsel %vm1352_vm7, %v3928_v13, %v3942_v30  ;;  %v1358_v35 = vsel %vm1352_vm7, %v3933_v16, %v3943_v29  ;;  %v3946_v36 = vpop.permute.xlu0 %3945  ;;  %1432 = vmatprep.mubr.f32.mxu0 %v4011_v1 }
  0xb7   : > { %v3700_v37 = vpack.c.bf16 %v1358_v35, %v1355_v34  ;;  %v3948_v38 = vunpack.i.h.bf16 %v3946_v36  ;;  %v3947_v39 = vunpack.i.l.bf16 %v3946_v36  ;;  %v3951_v40 = vpop.permute.xlu1 %3950  ;;  %v3472_v34 = vld [vmem:[%s4437_s1 + $0x8] sm:$0xff] }
  0xb8   : > { %v3953_v41 = vunpack.i.h.bf16 %v3951_v40  ;;  %v3952_v42 = vunpack.i.l.bf16 %v3951_v40  ;;  %3698 = vmatpush1.bf16.msra.mxu0 %v3697_v33 }
  0xb9   : > { %3701 = vmatpush3.bf16.msra.mxu1 %v3700_v37  ;;  %v1532_v44 = vsel %vm1530_vm8, %v3947_v39, %v3948_v38 }
  0xba   : > { %v3956_v45 = vpop.permute.xlu0 %3955  ;;  %v1535_v46 = vsel %vm1530_vm8, %v3952_v42, %v3953_v41  ;;  %3706 = vmatprep.subr.bf16.mxu1 %v4009_v0 }
  0xbb   : > { %v3958_v47 = vunpack.i.h.bf16 %v3956_v45  ;;  %v3957_v48 = vunpack.i.l.bf16 %v3956_v45  ;;  %v3961_v49 = vpop.permute.xlu1 %3960  ;;  %v3702_v50 = vpack.c.bf16 %v1535_v46, %v1532_v44 }
  0xbc   : > { %v3963_v51 = vunpack.i.h.bf16 %v3961_v49  ;;  %v3962_v52 = vunpack.i.l.bf16 %v3961_v49  ;;  %3592 = vmatmul.mubr.msk.f32.vlgmr.msra.gmra.mrb[0].mxu1 %vm288_vm1, %v3461_v43  ;;  %3462 = vmatmul.mubr.msk.f32.vlgmr.msra.gmra.mrb[0].mxu0 %vm288_vm1, %v3461_v43 }
  0xbd   : > { %v1531_v53 = vsel %vm1530_vm8, %v3957_v48, %v3947_v39  ;;  %v1534_v54 = vsel %vm1530_vm8, %v3958_v47, %v3952_v42  ;;  %3703 = vmatprep.subr.bf16.mxu0 %v3702_v50  ;;  %3598 = vmatprep.mubr.msk.f32.mxu1 %vm4010_vm0, %v4011_v1  ;;  %v3475_v42 = vld [vmem:[%s4437_s1 + $0x10] sm:$0xff]  ;;  %v3478_v50 = vld [vmem:[%s4437_s1 + $0x18] sm:$0xff] }
  0xbe   : > { %v3704_v55 = vpack.c.bf16 %v1534_v54, %v1531_v53  ;;  %v1533_v56 = vsel %vm1530_vm8, %v3948_v38, %v3962_v52  ;;  %v1536_v57 = vsel %vm1530_vm8, %v3953_v41, %v3963_v51  ;;  %v3966_v58 = vpop.permute.xlu0 %3965  ;;  %1610 = vmatprep.mubr.f32.mxu0 %v4011_v1 }
  0xbf   : > { %v3707_v59 = vpack.c.bf16 %v1536_v57, %v1533_v56  ;;  %v3968_v60 = vunpack.i.h.bf16 %v3966_v58  ;;  %v3967_v61 = vunpack.i.l.bf16 %v3966_v58  ;;  %v3971_v62 = vpop.permute.xlu1 %3970  ;;  %v3481_v58 = vld [vmem:[%s4437_s1 + $0x20] sm:$0xff] }
  0xc0   : > { %v3973_v63 = vunpack.i.h.bf16 %v3971_v62  ;;  %v3972_v2 = vunpack.i.l.bf16 %v3971_v62  ;;  %3705 = vmatpush1.bf16.msra.mxu0 %v3704_v55 }
  0xc1   : > { %3708 = vmatpush3.bf16.msra.mxu1 %v3707_v59  ;;  %v1710_v4 = vsel %vm1708_vm9, %v3967_v61, %v3968_v60 }
  0xc2   : > { %v3976_v5 = vpop.permute.xlu0 %3975  ;;  %v1713_v6 = vsel %vm1708_vm9, %v3972_v2, %v3973_v63  ;;  %3713 = vmatprep.subr.bf16.mxu1 %v4009_v0 }
  0xc3   : > { %v3978_v7 = vunpack.i.h.bf16 %v3976_v5  ;;  %v3977_v8 = vunpack.i.l.bf16 %v3976_v5  ;;  %v3981_v9 = vpop.permute.xlu1 %3980  ;;  %v3709_v10 = vpack.c.bf16 %v1713_v6, %v1710_v4  ;;  %v3484_v4 = vld [vmem:[%s4437_s1 + $0x28] sm:$0xff] }
  0xc4   : > { %v3983_v11 = vunpack.i.h.bf16 %v3981_v9  ;;  %v3982_v12 = vunpack.i.l.bf16 %v3981_v9  ;;  %3599 = vmatmul.mubr.msk.f32.vlgmr.msra.gmra.mrb[0].mxu1 %vm288_vm1, %v3464_v3  ;;  %3465 = vmatmul.mubr.msk.f32.vlgmr.msra.gmra.mrb[0].mxu0 %vm288_vm1, %v3464_v3 }
  0xc5   : > { %v1709_v13 = vsel %vm1708_vm9, %v3977_v8, %v3967_v61  ;;  %v1712_v14 = vsel %vm1708_vm9, %v3978_v7, %v3972_v2  ;;  %3710 = vmatprep.subr.bf16.mxu0 %v3709_v10  ;;  %3605 = vmatprep.mubr.msk.f32.mxu1 %vm4010_vm0, %v4011_v1  ;;  %v3487_v10 = vld [vmem:[%s4437_s1 + $0x30] sm:$0xff] }
  0xc6   : > { %v3711_v15 = vpack.c.bf16 %v1712_v14, %v1709_v13  ;;  %v1711_v0 = vsel %vm1708_vm9, %v3968_v60, %v3982_v12  ;;  %v1714_v16 = vsel %vm1708_vm9, %v3973_v63, %v3983_v11  ;;  %1788 = vmatprep.mubr.f32.mxu0 %v4011_v1  ;;  %v2032_v17 = vpop.permute.xlu0 %2031 }
  0xc7   : > { %v3714_v21 = vpack.c.bf16 %v1714_v16, %v1711_v0  ;;  %v2034_v22 = vpop.permute.xlu1 %2033 }
  0xc8   : > { %3712 = vmatpush1.bf16.msra.mxu0 %v3711_v15  ;;  %v2038_v26 = vsel %vm462_vm2, %v2032_v17, %v2034_v22 }
  0xc9   : > { %3715 = vmatpush3.bf16.msra.mxu1 %v3714_v21  ;;  %1879 = vmatprep.subr.mxu0 %v4124_v18 }
  0xca   : > { %3608 = vmatprep.subr.mxu1 %v4011_v1  ;;  %v2030_v24 = vpop.permute.xlu0 %2029 }
  0xcb   : > { %v2036_v25 = vpop.permute.xlu1 %2035  ;;  %v2037_v29 = vsel %vm462_vm2, %v2030_v24, %v2032_v17  ;;  %v3490_v17 = vld [vmem:[%s4437_s1 + $0x38] sm:$0xff] }
  0xcc   : > { %3606 = vmatmul.mubr.msk.f32.vlgmr.msra.gmra.mrb[0].mxu1 %vm288_vm1, %v3467_v23  ;;  %3468 = vmatmul.mubr.msk.f32.vlgmr.msra.gmra.mrb[0].mxu0 %vm288_vm1, %v3467_v23  ;;  %v3493_v23 = vld [vmem:[%s4437_s1 + $0x40] sm:$0xff] }
  0xcd   : > { %1880 = vmatpush1.msra.mxu0 %v4132_v20  ;;  %3609 = vmatpush3.msra.mxu1 %v4126_v19  ;;  %v2039_v20 = vsel %vm462_vm2, %v2034_v22, %v2036_v25 }
  0xce   : > { %3610 = vmatprep.mubr.msk.f32.mxu1 %vm4010_vm0, %v4011_v1  ;;  %1943 = vmatprep.mubr.f32.mxu0 %v4011_v1  ;;  %v2195_v18 = vpop.permute.xlu0 %2194 }
  0xcf   : > { %2046 = vmatprep.subr.mxu0 %v2038_v26  ;;  %3613 = vmatprep.subr.mxu1 %v4011_v1  ;;  %v2197_v27 = vpop.permute.xlu1 %2196 }
  0xd0   : > { %v2201_v31 = vsel %vm640_vm3, %v2195_v18, %v2197_v27 }
  0xd2   : > { %v2193_v19 = vpop.permute.xlu0 %2192 }
  0xd3   : > { %v2199_v30 = vpop.permute.xlu1 %2198  ;;  %v2200_v35 = vsel %vm640_vm3, %v2193_v19, %v2195_v18 }
  0xd4   : > { %3611 = vmatmul.mubr.msk.f32.vlgmr.msra.gmra.mrb[0].mxu1 %vm1875_vm10, %v1874_v28  ;;  %3470 = vmatmul.mubr.msk.f32.vlgmr.msra.gmra.mrb[0].mxu0 %vm1875_vm10, %v1874_v28  ;;  %v2202_v36 = vsel %vm640_vm3, %v2197_v27, %v2199_v30 }
  0xd5   : > { %2047 = vmatpush1.msra.mxu0 %v2037_v29  ;;  %3614 = vmatpush3.msra.mxu1 %v2039_v20 }
  0xd6   : > { %3615 = vmatprep.mubr.msk.f32.mxu1 %vm4010_vm0, %v4011_v1  ;;  %2110 = vmatprep.mubr.f32.mxu0 %v4011_v1  ;;  %v2358_v32 = vpop.permute.xlu0 %2357 }
  0xd7   : > { %2209 = vmatprep.subr.mxu0 %v2201_v31  ;;  %3618 = vmatprep.subr.mxu1 %v4011_v1  ;;  %v2360_v33 = vpop.permute.xlu1 %2359 }
  0xd8   : > { %v2364_v39 = vsel %vm818_vm4, %v2358_v32, %v2360_v33 }
  0xda   : > { %v2356_v37 = vpop.permute.xlu0 %2355 }
  0xdb   : > { %v2362_v38 = vpop.permute.xlu1 %2361  ;;  %v2363_v43 = vsel %vm818_vm4, %v2356_v37, %v2358_v32 }
  0xdc   : > { %3616 = vmatmul.mubr.msk.f32.vlgmr.msra.gmra.mrb[0].mxu1 %vm1875_vm10, %v3472_v34  ;;  %3473 = vmatmul.mubr.msk.f32.vlgmr.msra.gmra.mrb[0].mxu0 %vm1875_vm10, %v3472_v34  ;;  %v2365_v44 = vsel %vm818_vm4, %v2360_v33, %v2362_v38 }
  0xdd   : > { %2210 = vmatpush1.msra.mxu0 %v2200_v35  ;;  %3619 = vmatpush3.msra.mxu1 %v2202_v36 }
  0xde   : > { %3620 = vmatprep.mubr.msk.f32.mxu1 %vm4010_vm0, %v4011_v1  ;;  %2273 = vmatprep.mubr.f32.mxu0 %v4011_v1  ;;  %v2521_v40 = vpop.permute.xlu0 %2520 }
  0xdf   : > { %2372 = vmatprep.subr.mxu0 %v2364_v39  ;;  %3623 = vmatprep.subr.mxu1 %v4011_v1  ;;  %v2523_v41 = vpop.permute.xlu1 %2522 }
  0xe0   : > { %v2527_v47 = vsel %vm996_vm5, %v2521_v40, %v2523_v41 }
  0xe2   : > { %v2519_v45 = vpop.permute.xlu0 %2518 }
  0xe3   : > { %v2525_v46 = vpop.permute.xlu1 %2524  ;;  %v2526_v51 = vsel %vm996_vm5, %v2519_v45, %v2521_v40 }
  0xe4   : > { %3621 = vmatmul.mubr.msk.f32.vlgmr.msra.gmra.mrb[0].mxu1 %vm1875_vm10, %v3475_v42  ;;  %3476 = vmatmul.mubr.msk.f32.vlgmr.msra.gmra.mrb[0].mxu0 %vm1875_vm10, %v3475_v42  ;;  %v2528_v52 = vsel %vm996_vm5, %v2523_v41, %v2525_v46 }
  0xe5   : > { %2373 = vmatpush1.msra.mxu0 %v2363_v43  ;;  %3624 = vmatpush3.msra.mxu1 %v2365_v44 }
  0xe6   : > { %3625 = vmatprep.mubr.msk.f32.mxu1 %vm4010_vm0, %v4011_v1  ;;  %2436 = vmatprep.mubr.f32.mxu0 %v4011_v1  ;;  %v2684_v48 = vpop.permute.xlu0 %2683 }
  0xe7   : > { %2535 = vmatprep.subr.mxu0 %v2527_v47  ;;  %3628 = vmatprep.subr.mxu1 %v4011_v1  ;;  %v2686_v49 = vpop.permute.xlu1 %2685 }
  0xe8   : > { %v2690_v55 = vsel %vm1174_vm6, %v2684_v48, %v2686_v49 }
  0xea   : > { %v2682_v53 = vpop.permute.xlu0 %2681 }
  0xeb   : > { %v2688_v54 = vpop.permute.xlu1 %2687  ;;  %v2689_v59 = vsel %vm1174_vm6, %v2682_v53, %v2684_v48 }
  0xec   : > { %3626 = vmatmul.mubr.msk.f32.vlgmr.msra.gmra.mrb[0].mxu1 %vm1875_vm10, %v3478_v50  ;;  %3479 = vmatmul.mubr.msk.f32.vlgmr.msra.gmra.mrb[0].mxu0 %vm1875_vm10, %v3478_v50  ;;  %v2691_v60 = vsel %vm1174_vm6, %v2686_v49, %v2688_v54 }
  0xed   : > { %2536 = vmatpush1.msra.mxu0 %v2526_v51  ;;  %3629 = vmatpush3.msra.mxu1 %v2528_v52 }
  0xee   : > { %3630 = vmatprep.mubr.msk.f32.mxu1 %vm4010_vm0, %v4011_v1  ;;  %2599 = vmatprep.mubr.f32.mxu0 %v4011_v1  ;;  %v2847_v56 = vpop.permute.xlu0 %2846 }
  0xef   : > { %2698 = vmatprep.subr.mxu0 %v2690_v55  ;;  %3633 = vmatprep.subr.mxu1 %v4011_v1  ;;  %v2849_v57 = vpop.permute.xlu1 %2848 }
  0xf0   : > { %v2853_v63 = vsel %vm1352_vm7, %v2847_v56, %v2849_v57 }
  0xf2   : > { %v2845_v61 = vpop.permute.xlu0 %2844 }
  0xf3   : > { %v2851_v62 = vpop.permute.xlu1 %2850  ;;  %v2852_v5 = vsel %vm1352_vm7, %v2845_v61, %v2847_v56 }
  0xf4   : > { %3631 = vmatmul.mubr.msk.f32.vlgmr.msra.gmra.mrb[0].mxu1 %vm1875_vm10, %v3481_v58  ;;  %3482 = vmatmul.mubr.msk.f32.vlgmr.msra.gmra.mrb[0].mxu0 %vm1875_vm10, %v3481_v58  ;;  %v2854_v6 = vsel %vm1352_vm7, %v2849_v57, %v2851_v62 }
  0xf5   : > { %2699 = vmatpush1.msra.mxu0 %v2689_v59  ;;  %3634 = vmatpush3.msra.mxu1 %v2691_v60 }
  0xf6   : > { %3635 = vmatprep.mubr.msk.f32.mxu1 %vm4010_vm0, %v4011_v1  ;;  %2762 = vmatprep.mubr.f32.mxu0 %v4011_v1  ;;  %v3010_v2 = vpop.permute.xlu0 %3009 }
  0xf7   : > { %2861 = vmatprep.subr.mxu0 %v2853_v63  ;;  %3638 = vmatprep.subr.mxu1 %v4011_v1  ;;  %v3012_v3 = vpop.permute.xlu1 %3011 }
  0xf8   : > { %v3016_v9 = vsel %vm1530_vm8, %v3010_v2, %v3012_v3 }
  0xfa   : > { %v3008_v7 = vpop.permute.xlu0 %3007 }
  0xfb   : > { %v3014_v8 = vpop.permute.xlu1 %3013  ;;  %v3015_v13 = vsel %vm1530_vm8, %v3008_v7, %v3010_v2 }
  0xfc   : > { %3636 = vmatmul.mubr.msk.f32.vlgmr.msra.gmra.mrb[0].mxu1 %vm1875_vm10, %v3484_v4  ;;  %3485 = vmatmul.mubr.msk.f32.vlgmr.msra.gmra.mrb[0].mxu0 %vm1875_vm10, %v3484_v4  ;;  %v3017_v14 = vsel %vm1530_vm8, %v3012_v3, %v3014_v8 }
  0xfd   : > { %2862 = vmatpush1.msra.mxu0 %v2852_v5  ;;  %3639 = vmatpush3.msra.mxu1 %v2854_v6 }
  0xfe   : > { %3640 = vmatprep.mubr.msk.f32.mxu1 %vm4010_vm0, %v4011_v1  ;;  %2925 = vmatprep.mubr.f32.mxu0 %v4011_v1  ;;  %v3173_v11 = vpop.permute.xlu0 %3172 }
  0xff   : > { %3024 = vmatprep.subr.mxu0 %v3016_v9  ;;  %3643 = vmatprep.subr.mxu1 %v4011_v1  ;;  %v3175_v12 = vpop.permute.xlu1 %3174 }
 0x100   : > { %v3179_v15 = vsel %vm1708_vm9, %v3173_v11, %v3175_v12 }
 0x102   : > { %v3171_v0 = vpop.permute.xlu0 %3170 }
 0x103   : > { %v3178_v21 = vsel %vm1708_vm9, %v3171_v0, %v3173_v11 }
 0x104   : > { %3641 = vmatmul.mubr.msk.f32.vlgmr.msra.gmra.mrb[0].mxu1 %vm1875_vm10, %v3487_v10  ;;  %3488 = vmatmul.mubr.msk.f32.vlgmr.msra.gmra.mrb[0].mxu0 %vm1875_vm10, %v3487_v10  ;;  %v3177_v16 = vpop.permute.xlu1 %3176 }
 0x105   : > { %3025 = vmatpush1.msra.mxu0 %v3015_v13  ;;  %3644 = vmatpush3.msra.mxu1 %v3017_v14  ;;  %v3180_v22 = vsel %vm1708_vm9, %v3175_v12, %v3177_v16 }
 0x106   : > { %3645 = vmatprep.mubr.msk.f32.mxu1 %vm4010_vm0, %v4011_v1  ;;  %3088 = vmatprep.mubr.f32.mxu0 %v4011_v1 }
 0x107   : > { %3187 = vmatprep.subr.mxu0 %v3179_v15  ;;  %3648 = vmatprep.subr.mxu1 %v4011_v1 }
 0x10c   : > { %3646 = vmatmul.mubr.msk.f32.vlgmr.msra.gmra.mrb[0].mxu1 %vm1875_vm10, %v3490_v17  ;;  %3491 = vmatmul.mubr.msk.f32.vlgmr.msra.gmra.mrb[0].mxu0 %vm1875_vm10, %v3490_v17 }
 0x10d   : > { %3188 = vmatpush1.msra.mxu0 %v3178_v21  ;;  %3649 = vmatpush3.msra.mxu1 %v3180_v22 }
 0x10e   : > { %3650 = vmatprep.mubr.msk.f32.mxu1 %vm4010_vm0, %v4011_v1  ;;  %3251 = vmatprep.mubr.f32.mxu0 %v4011_v1 }
 0x114   : > { %3651 = vmatmul.mubr.msk.f32.vlgmr.msra.gmra.mrb[0].mxu1 %vm1875_vm10, %v3493_v23  ;;  %3494 = vmatmul.mubr.msk.f32.vlgmr.msra.gmra.mrb[0].mxu0 %vm1875_vm10, %v3493_v23 }
 0x115   : > { %v273_v24 = vpop.permute.xlu0 %272 }
 0x1e7   : > { %v3324_v25 = vpop.f32.mrb[0].mxu1  ;;  %v3253_v26 = vpop.f32.mrb[0].mxu0 }
 0x1e8   : > { %v3718_v18 = vadd.f32 %v3324_v25, %v273_v24  ;;  %v3716_v27 = vadd.f32 %v3253_v26, %v273_v24  ;;  %v3652_v28 = vpop.f32.mrb[1].mxu1  ;;  %v3255_v29 = vpop.f32.mrb[1].mxu0 }
 0x1e9   : > { %v3717_v1 = vadd.f32 %v3255_v29, %v273_v24 }
 0x1ea   : > { %v3333_v20 = vmax.f32 %v3718_v18, 0.0  ;;  %v3331_v19 = vmax.f32 %v3716_v27, 0.0 }
 0x1eb   : > { %v3332_v30 = vmax.f32 %v3717_v1, 0.0 }
 0x1ec   : > { %3336 = vst [vmem:[%s266_s12 + $0x10] sm:$0xff] %v3333_v20  ;;  %3334 = vst [vmem:[%s266_s12] sm:$0xff] %v3331_v19 }
 0x1ed   : > { %3335 = vst [vmem:[%s266_s12 + $0x8] sm:$0xff] %v3332_v30 }
 0x1ee PF: > { %s15_s20 = sadd.s32 1, %s4007_s20   ;;  %s4442_s18 = smov %s4003_s19 }
 0x1ef   : > { %p12_p5 = scmp.ge.s32.totalorder %s15_s20, 10   ;;  %s4443_s19 = smov %s4445_s21 }
 0x1f1   :  { %14 = sbr.rel (!%p12_p5) target bundleno = 2 (0x2), region = 91 }

// kernel: _lambda_.8
= control target key start
LH: loop header
LB: loop body
LE: loop exit
PB: predicated region body
PF: predicated region fallthrough
CT: control target
= control target key end

     0   :  { %s468_s12 = smov 0   ;;  %s470_s13 = smov 0   ;;  %s507_s0 = inlined_call_operand.vmem [shape: f32[1,2,8], index: 0, kind: input, shape index: {}]   ;;  %s508_s1 = inlined_call_operand.vmem [shape: f32[2,1], index: 1, kind: input, shape index: {}]   ;;  %s509_s2 = inlined_call_operand.vmem [shape: f32[8,8,256], index: 2, kind: input, shape index: {}]   ;;  %s510_s3 = inlined_call_operand.vmem [shape: f32[8,2,256], index: 3, kind: output, shape index: {}]  }
   0x1   :  { %s472_s14 = smov 0  }
   0x2 LB: > { %s25_s15 = sadd.s32 1, %s440_s13  ;;  %p384_p0 = scmp.ge.s32.totalorder %s444_s14, 1  ;;  %s444_s14 = sphi %s472_s14, %s13_s14   ;;  %s440_s13 = sphi %s470_s13, %s512_s13   ;;  %s436_s12 = sphi %s468_s12, %s511_s12  }
   0x3   : > { %p27_p1 = scmp.ge.s32.totalorder %s25_s15, 8  ;;  %p151_p2 = scmp.lt.s32.totalorder %s444_s14, 9 }
   0x5   : > { %s514_s15 = smov (%p27_p1, %s25_s15), 0  ;;  %p152_p3 = pnand %p384_p0, %p151_p2 }
   0x6   : > { %p179_p4 = scmp.lt.s32.totalorder (!%p152_p3), %s436_s12, 7  ;;  %v446_v0 = vmov (!%p152_p3), 0.0   ;;  %v447_v1 = vmov (!%p152_p3), 0   ;;  %v195_v2 = vld [vmem:[%s508_s1] sm:$0x3] (!%p152_p3)  ;;  %vm208_vm0 = vcmask (!%p152_p3), 64512  }
   0x7   : > { %155 = sbr.rel (%p152_p3) target bundleno = 238 (0xee), region = 32  ;;  %276 = vmatprep.mubr.f32.mxu0 (!%p152_p3), %v446_v0  ;;  %421 = vset.pattern.permute.xlu0 (!%p152_p3), %v447_v1  ;;  %v207_v5 = vld [vmem:[%s507_s0] sm:$0x3] (!%p152_p3) }
   0x8   : > { %198 = vperm.xlu0 (!%p152_p3), %421, %v195_v2  }
   0xe   : > { %s516_s12 = smov (!%p179_p4, %s436_s12), 7 }
   0xf   : > { %s393_s18 = sshll.u32 %s516_s12, 4  ;;  %s394_s24 = sshll.u32 %s516_s12, 2 }
  0x10   : > { %s183_s21 = scalar_lea.vmem %s509_s2, %s393_s18  ;;  %s192_s27 = scalar_lea.vmem %s510_s3, %s394_s24 }
  0x11   : > { %v206_v3 = vld [vmem:[%s183_s21 + $0x8] sm:$0xff]  ;;  %v205_v4 = vld [vmem:[%s183_s21] sm:$0xff] }
  0x12   : > { %212 = vmatprep.subr.mxu0 %v206_v3 }
  0x13   : > { %213 = vmatpush1.msra.mxu0 %v205_v4 }
  0x14   : > { %389 = vmatmul.mubr.msk.f32.vlgmr.msra.gmra.mrb[0].mxu0 %vm208_vm0, %v207_v5 }
  0x87   : > { %v199_v6 = vpop.permute.xlu0 %198 }
  0xe7   : > { %v278_v7 = vpop.f32.mrb[0].mxu0 }
  0xe8   : > { %v283_v8 = vadd.f32 %v278_v7, %v199_v6  ;;  %v280_v9 = vpop.f32.mrb[1].mxu0 }
  0xe9   : > { %v284_v10 = vadd.f32 %v280_v9, %v199_v6 }
  0xeb   : > { %v287_v11 = vcombine.low %v283_v8, %v284_v10 }
  0xed   : > { %390 = vst.sshfl [vmem:[%s192_s27] sm:$0x33 pattern:$0x76325410] %v287_v11 }
  0xee PF: > { %s13_s14 = sadd.s32 1, %s444_s14   ;;  %s511_s12 = smov %s440_s13 }
  0xef   : > { %p10_p5 = scmp.ge.s32.totalorder %s13_s14, 10   ;;  %s512_s13 = smov %s514_s15 }
  0xf1   :  { %12 = sbr.rel (!%p10_p5) target bundleno = 2 (0x2), region = 63 }

// kernel: _lambda_.9
= control target key start
LH: loop header
LB: loop body
LE: loop exit
PB: predicated region body
PF: predicated region fallthrough
CT: control target
= control target key end

     0   :  { %s417_s6 = smov 0   ;;  %s419_s7 = smov 0   ;;  %s580_s0 = inlined_call_operand.vmem [shape: f32[2,8,16,16], index: 0, kind: input, shape index: {}]   ;;  %s581_s1 = inlined_call_operand.vmem [shape: f32[2,8,16,16], index: 1, kind: output, shape index: {}]  }
   0x1   :  { %s421_s8 = smov 0  }
   0x2 LB: > { %s23_s9 = sadd.s32 1, %s401_s7  ;;  %p346_p0 = scmp.ge.s32.totalorder %s405_s8, 1  ;;  %s405_s8 = sphi %s421_s8, %s11_s8   ;;  %s401_s7 = sphi %s419_s7, %s583_s7   ;;  %s397_s6 = sphi %s417_s6, %s582_s6  }
   0x3   : > { %p25_p1 = scmp.ge.s32.totalorder %s23_s9, 2  ;;  %p108_p2 = scmp.lt.s32.totalorder %s405_s8, 3 }
   0x5   : > { %s585_s9 = smov (%p25_p1, %s23_s9), 0  ;;  %p109_p3 = pnand %p346_p0, %p108_p2 }
   0x6   : > { %p137_p4 = scmp.lt.s32.totalorder (!%p109_p3), %s397_s6, 1  ;;  %vm188_vm0 = vcmask (!%p109_p3), 130048  }
   0x7   : > { %112 = sbr.rel (%p109_p3) target bundleno = 58 (0x3a), region = 24 }
   0xe   : > { %s587_s6 = smov (!%p137_p4, %s397_s6), 1 }
   0xf   : > { %s353_s10 = sshll.u32 %s587_s6, 7 }
  0x10   : > { %s443_s13 = scalar_lea.vmem %s580_s0, %s353_s10  ;;  %s526_s16 = scalar_lea.vmem %s581_s1, %s353_s10 }
  0x11   : > { %v446_v0 = vld [vmem:[%s443_s13] sm:$0xff]  ;;  %v449_v1 = vld [vmem:[%s443_s13 + $0x10] sm:$0xff]  ;;  %v472_v10 = vld [vmem:[%s443_s13 + $0x8] sm:$0xff] }
  0x12   : > { %v452_v2 = vld [vmem:[%s443_s13 + $0x20] sm:$0xff]  ;;  %v455_v3 = vld [vmem:[%s443_s13 + $0x30] sm:$0xff]  ;;  %v172_v5 = vmul.f32 %v446_v0, %v446_v0  ;;  %v174_v6 = vmul.f32 %v449_v1, %v449_v1  ;;  %v479_v14 = vld [vmem:[%s443_s13 + $0x18] sm:$0xff]  ;;  %v173_v23 = vmul.f32 %v472_v10, %v472_v10 }
  0x13   : > { %v458_v4 = vld [vmem:[%s443_s13 + $0x40] sm:$0xff]  ;;  %v176_v7 = vmul.f32 %v452_v2, %v452_v2  ;;  %v467_v8 = vld [vmem:[%s443_s13 + $0x50] sm:$0xff]  ;;  %v178_v9 = vmul.f32 %v455_v3, %v455_v3  ;;  %v482_v15 = vld [vmem:[%s443_s13 + $0x28] sm:$0xff]  ;;  %v175_v26 = vmul.f32 %v479_v14, %v479_v14 }
  0x14   : > { %v180_v11 = vmul.f32 %v458_v4, %v458_v4  ;;  %v189_v12 = vsel %vm188_vm0, %v172_v5, 0.0  ;;  %v190_v13 = vsel %vm188_vm0, %v174_v6, 0.0  ;;  %v485_v16 = vld [vmem:[%s443_s13 + $0x38] sm:$0xff]  ;;  %v168_v17 = vld [vmem:[%s443_s13 + $0x60] sm:$0xff]  ;;  %v490_v20 = vld [vmem:[%s443_s13 + $0x48] sm:$0xff]  ;;  %v182_v21 = vmul.f32 %v467_v8, %v467_v8 }
  0x15   : > { %v191_v18 = vadd.f32 %v190_v13, %v189_v12  ;;  %v192_v19 = vsel %vm188_vm0, %v176_v7, 0.0  ;;  %v194_v22 = vsel %vm188_vm0, %v178_v9, 0.0  ;;  %v170_v24 = vld [vmem:[%s443_s13 + $0x70] sm:$0xff]  ;;  %v177_v27 = vmul.f32 %v482_v15, %v482_v15  ;;  %v167_v31 = vld [vmem:[%s443_s13 + $0x58] sm:$0xff]  ;;  %v169_v39 = vld [vmem:[%s443_s13 + $0x68] sm:$0xff] }
  0x16   : > { %v179_v28 = vmul.f32 %v485_v16, %v485_v16  ;;  %v184_v29 = vmul.f32 %v168_v17, %v168_v17  ;;  %v196_v30 = vsel %vm188_vm0, %v180_v11, 0.0  ;;  %v181_v32 = vmul.f32 %v490_v20, %v490_v20  ;;  %v171_v45 = vld [vmem:[%s443_s13 + $0x78] sm:$0xff] }
  0x17   : > { %v193_v25 = vadd.f32 %v192_v19, %v191_v18  ;;  %v204_v34 = vsel %vm188_vm0, %v173_v23, 0.0  ;;  %v205_v35 = vsel %vm188_vm0, %v175_v26, 0.0  ;;  %v207_v36 = vsel %vm188_vm0, %v177_v27, 0.0 }
  0x18   : > { %v186_v37 = vmul.f32 %v170_v24, %v170_v24  ;;  %v198_v38 = vsel %vm188_vm0, %v182_v21, 0.0  ;;  %v206_v40 = vadd.f32 %v205_v35, %v204_v34  ;;  %v183_v42 = vmul.f32 %v167_v31, %v167_v31 }
  0x19   : > { %v195_v33 = vadd.f32 %v194_v22, %v193_v25  ;;  %v209_v43 = vsel %vm188_vm0, %v179_v28, 0.0  ;;  %v200_v44 = vsel %vm188_vm0, %v184_v29, 0.0  ;;  %v185_v48 = vmul.f32 %v169_v39, %v169_v39 }
  0x1a   : > { %v208_v46 = vadd.f32 %v207_v36, %v206_v40  ;;  %v211_v49 = vsel %vm188_vm0, %v181_v32, 0.0  ;;  %v202_v50 = vsel %vm188_vm0, %v186_v37, 0.0  ;;  %v187_v53 = vmul.f32 %v171_v45, %v171_v45 }
  0x1b   : > { %v197_v41 = vadd.f32 %v196_v30, %v195_v33  ;;  %v213_v54 = vsel %vm188_vm0, %v183_v42, 0.0  ;;  %v215_v57 = vsel %vm188_vm0, %v185_v48, 0.0 }
  0x1c   : > { %v210_v51 = vadd.f32 %v209_v43, %v208_v46  ;;  %v217_v60 = vsel %vm188_vm0, %v187_v53, 0.0 }
  0x1d   : > { %v199_v47 = vadd.f32 %v198_v38, %v197_v41 }
  0x1e   : > { %v212_v55 = vadd.f32 %v211_v49, %v210_v51 }
  0x1f   : > { %v201_v52 = vadd.f32 %v200_v44, %v199_v47 }
  0x20   : > { %v214_v58 = vadd.f32 %v213_v54, %v212_v55 }
  0x21   : > { %v203_v56 = vadd.f32 %v202_v50, %v201_v52 }
  0x22   : > { %v216_v61 = vadd.f32 %v215_v57, %v214_v58 }
  0x23   : > { %v219_v59 = vadd.f32 1e-12, %v203_v56 }
  0x24   : > { %v218_v62 = vadd.f32 %v217_v60, %v216_v61 }
  0x25   : > { %379 = vrsqrt.f32 %v219_v59 }
  0x26   : > { %v220_v63 = vadd.f32 1e-12, %v218_v62 }
  0x28   : > { %381 = vrsqrt.f32 %v220_v63 }
  0x2f   : > { %v380_v5 = vpop.eup %379 }
  0x30   : > { %v223_v6 = vmul.f32 %v380_v5, %v446_v0  ;;  %v225_v7 = vmul.f32 %v380_v5, %v449_v1  ;;  %v227_v9 = vmul.f32 %v380_v5, %v452_v2  ;;  %v229_v11 = vmul.f32 %v380_v5, %v455_v3 }
  0x31   : > { %v231_v12 = vmul.f32 %v380_v5, %v458_v4  ;;  %v233_v13 = vmul.f32 %v380_v5, %v467_v8  ;;  %v235_v18 = vmul.f32 %v380_v5, %v168_v17  ;;  %v237_v19 = vmul.f32 %v380_v5, %v170_v24 }
  0x32   : > { %239 = vst.msk [vmem:[%s526_s16] sm:$0xff] %vm188_vm0, %v223_v6  ;;  %241 = vst.msk [vmem:[%s526_s16 + $0x10] sm:$0xff] %vm188_vm0, %v225_v7  ;;  %v382_v0 = vpop.eup %381 }
  0x33   : > { %243 = vst.msk [vmem:[%s526_s16 + $0x20] sm:$0xff] %vm188_vm0, %v227_v9  ;;  %245 = vst.msk [vmem:[%s526_s16 + $0x30] sm:$0xff] %vm188_vm0, %v229_v11  ;;  %v224_v1 = vmul.f32 %v382_v0, %v472_v10  ;;  %v226_v2 = vmul.f32 %v382_v0, %v479_v14  ;;  %v228_v3 = vmul.f32 %v382_v0, %v482_v15 }
  0x34   : > { %247 = vst.msk [vmem:[%s526_s16 + $0x40] sm:$0xff] %vm188_vm0, %v231_v12  ;;  %249 = vst.msk [vmem:[%s526_s16 + $0x50] sm:$0xff] %vm188_vm0, %v233_v13  ;;  %v230_v4 = vmul.f32 %v382_v0, %v485_v16  ;;  %v232_v8 = vmul.f32 %v382_v0, %v490_v20  ;;  %v234_v17 = vmul.f32 %v382_v0, %v167_v31 }
  0x35   : > { %251 = vst.msk [vmem:[%s526_s16 + $0x60] sm:$0xff] %vm188_vm0, %v235_v18  ;;  %253 = vst.msk [vmem:[%s526_s16 + $0x70] sm:$0xff] %vm188_vm0, %v237_v19  ;;  %v236_v21 = vmul.f32 %v382_v0, %v169_v39  ;;  %v238_v22 = vmul.f32 %v382_v0, %v171_v45 }
  0x36   : > { %240 = vst.msk [vmem:[%s526_s16 + $0x8] sm:$0xff] %vm188_vm0, %v224_v1  ;;  %242 = vst.msk [vmem:[%s526_s16 + $0x18] sm:$0xff] %vm188_vm0, %v226_v2 }
  0x37   : > { %244 = vst.msk [vmem:[%s526_s16 + $0x28] sm:$0xff] %vm188_vm0, %v228_v3  ;;  %246 = vst.msk [vmem:[%s526_s16 + $0x38] sm:$0xff] %vm188_vm0, %v230_v4 }
  0x38   : > { %248 = vst.msk [vmem:[%s526_s16 + $0x48] sm:$0xff] %vm188_vm0, %v232_v8  ;;  %250 = vst.msk [vmem:[%s526_s16 + $0x58] sm:$0xff] %vm188_vm0, %v234_v17 }
  0x39   : > { %252 = vst.msk [vmem:[%s526_s16 + $0x68] sm:$0xff] %vm188_vm0, %v236_v21  ;;  %254 = vst.msk [vmem:[%s526_s16 + $0x78] sm:$0xff] %vm188_vm0, %v238_v22 }
  0x3a PF: > { %s11_s8 = sadd.s32 1, %s405_s8   ;;  %s582_s6 = smov %s401_s7 }
  0x3b   : > { %p8_p5 = scmp.ge.s32.totalorder %s11_s8, 4   ;;  %s583_s7 = smov %s585_s9 }
  0x3d   :  { %10 = sbr.rel (!%p8_p5) target bundleno = 2 (0x2), region = 54 }

</bundles_post_ra>
